<compile_context>
chip_gen: v5e
topology: v5e:2x2
jax: 0.10.0
libtpu: 0.0.40
codegen_flags: <defaults>
</compile_context>

<pallas_src>
import jax
import jax.numpy as jnp
from jax import lax
from jax.experimental import pallas as pl
from jax.experimental.pallas import tpu as pltpu


# ------------------------------------------------------------------ fused MLP kernel

def fused_mlp(x, layers):
    """Fused (Linear + act)* chain in one pallas_call.

    x: (M, K) f32.  layers: list of (w:(K_i,N_i), b:(N_i,), act) with act in
    {"relu", "none"}.  Weights are cast to bf16 (f32 accumulate); intermediates
    never leave VMEM.
    """
    M = x.shape[0]
    acts = tuple(act for (_, _, act) in layers)

    def kernel(*refs):
        x_ref = refs[0]
        o_ref = refs[-1]
        h = x_ref[...]
        for li, act in enumerate(acts):
            w_ref = refs[1 + 2 * li]
            b_ref = refs[2 + 2 * li]
            h = jnp.dot(h.astype(jnp.bfloat16), w_ref[...],
                        preferred_element_type=jnp.float32) + b_ref[...]
            if act == "relu":
                h = jnp.maximum(h, 0.0)
        o_ref[...] = h

    args = [x.astype(jnp.float32)]
    in_specs = [pl.BlockSpec(x.shape, lambda i: (0, 0))]
    for (w, b, _) in layers:
        wf = w.astype(jnp.bfloat16)                 # halves weight DMA bytes
        bf = b.reshape(1, -1).astype(jnp.float32)   # bias add stays f32
        args += [wf, bf]
        in_specs += [pl.BlockSpec(wf.shape, lambda i: (0, 0)),
                     pl.BlockSpec(bf.shape, lambda i: (0, 0))]
    n_out = layers[-1][0].shape[1]

    # TODO(synk): at real sizes, tile the K=2301 contraction of the RF first layer
    # over an "arbitrary" grid axis so its weight DMA overlaps the matmul.
    return pl.pallas_call(
        kernel,
        out_shape=jax.ShapeDtypeStruct((M, n_out), jnp.float32),
        grid=(1,),
        in_specs=in_specs,
        out_specs=pl.BlockSpec((M, n_out), lambda i: (0, 0)),
    )(*args)


# --------------------------------------------------------- fused decoder body kernel

def _make_decoder_kernel(C, NP, E, H, PP, use_tanh_gelu):
    N = C * NP
    Dh = E // H
    scale = Dh ** -0.5

    def layernorm(x, g, b, eps=1e-5):
        # statistics kept in f32
        mu = jnp.mean(x, axis=-1, keepdims=True)
        var = jnp.mean(jnp.square(x - mu), axis=-1, keepdims=True)
        return (x - mu) * lax.rsqrt(var + eps) * g + b

    def kernel(feat_ref, pos_ref, rf_ref, gsd_ref,
               ln1_g, ln1_b, qkv_w, proj_w, proj_b,
               ln2_g, ln2_b, fc1_w, fc1_b, fc2_w, fc2_b,
               head_w, head_b, o_ref, xbuf, attn_buf):
        l = pl.program_id(1)

        # ---- prologue (only on the first layer step of each batch element) ----
        @pl.when(l == 0)
        def _():
            xin = feat_ref[0]            # (N, E), tokens in '(c t)' order
            pos = pos_ref[0]             # (NP, E)
            rfv = rf_ref[0]              # (C, E)
            gsdv = gsd_ref[0]            # (C, E)
            # TODO(synk): pad NP to a multiple of 8 at real sizes (NP=196) so these
            # per-channel row stores land on sublane boundaries.
            for c in range(C):
                r0 = c * NP
                xbuf[r0:r0 + NP, :] = (xin[r0:r0 + NP, :] + pos
                                       + rfv[c:c + 1, :] + gsdv[c:c + 1, :])

        x = xbuf[...]                    # (N, E) f32 activation carried across layers

        # ---- transformer block (timm Block, qkv_bias=False) ----
        h = layernorm(x, ln1_g[0], ln1_b[0])
        qkv = jnp.dot(h.astype(jnp.bfloat16), qkv_w[0],
                      preferred_element_type=jnp.float32)            # (N, 3E) f32

        # Per-head attention; head outputs go into column slices of attn_buf so the
        # projection below is ONE K=E matmul (full MXU depth) instead of H K=Dh ones.
        # TODO(synk): at real N (~800-2000) tile the query dimension flash-style and
        # convert this unrolled loop to lax.fori_loop to bound live ranges.
        for hh in range(H):
            lo = hh * Dh
            qh = qkv[:, lo:lo + Dh].astype(jnp.bfloat16)
            kh = qkv[:, E + lo:E + lo + Dh].astype(jnp.bfloat16)
            vh = qkv[:, 2 * E + lo:2 * E + lo + Dh].astype(jnp.bfloat16)
            s = lax.dot_general(qh, kh, (((1,), (1,)), ((), ())),
                                preferred_element_type=jnp.float32) * scale
            s = s - jnp.max(s, axis=-1, keepdims=True)
            p = jnp.exp(s)
            p = p * pl.reciprocal(jnp.sum(p, axis=-1, keepdims=True), approx=True)
            oh = jnp.dot(p.astype(jnp.bfloat16), vh,
                         preferred_element_type=jnp.float32)          # (N, Dh)
            attn_buf[:, lo:lo + Dh] = oh.astype(jnp.bfloat16)

        attn = jnp.dot(attn_buf[...], proj_w[0],
                       preferred_element_type=jnp.float32) + proj_b[0]
        x = x + attn

        h = layernorm(x, ln2_g[0], ln2_b[0])
        h = jnp.dot(h.astype(jnp.bfloat16), fc1_w[0],
                    preferred_element_type=jnp.float32) + fc1_b[0]
        h = jax.nn.gelu(h, approximate=use_tanh_gelu)   # tanh GELU on EUP by default
        h = jnp.dot(h.astype(jnp.bfloat16), fc2_w[0],
                    preferred_element_type=jnp.float32) + fc2_b[0]
        x = x + h

        xbuf[...] = x                    # carry to next layer step

        # ---- epilogue: head projection, only after the last layer ----
        @pl.when(l == pl.num_programs(1) - 1)
        def _():
            # TODO(synk): for PP < 128 at real sizes, present a lane-dense output
            # block (reshape (N, PP) -> (N*PP/128, 128) in the wrapper).
            o_ref[0] = (jnp.dot(x.astype(jnp.bfloat16), head_w[...],
                                preferred_element_type=jnp.float32) + head_b[...])

    return kernel


def _decoder_vmem_limit(N, NP, C, E, PP):
    per_layer_w = (3 * E * E + E * E + 4 * E * E + 4 * E * E) * 2   # bf16 matmul weights
    per_layer_v = (6 * E + 4 * E) * 4                               # f32 LN/bias vectors
    io_blocks = (N * E + NP * E + 2 * C * E + N * PP + PP) * 4 + E * PP * 2
    scratch = N * E * 4 + N * E * 2
    temps = (N * 3 * E + N * N + N * 4 * E + 2 * N * E) * 4
    est = int((2 * (per_layer_w + per_layer_v + io_blocks) + scratch + temps) * 1.5)
    # cap at v7x's 64 MiB/TC; floor well above toy sizes
    return max(32 * 1024 * 1024, min(est, 64 * 1024 * 1024))


def decoder_body(feats_bne, pos, rf_emb, gsd_emb, blocks, head_w, head_b, cfg):
    B, N, E = feats_bne.shape
    C = cfg["num_channels"]
    NP = cfg["num_patches"]
    H = cfg["num_head"]
    PP = cfg["patch_size"] ** 2
    L = blocks["qkv_w"].shape[0]

    def vec3(a):      # (L, D) f32 small vectors -> (L, 1, D) so blocks obey (8,128) rule
        return a.reshape(L, 1, -1).astype(jnp.float32)

    def lspec(a):     # stream one layer slice per grid step along the L axis
        return pl.BlockSpec((1,) + a.shape[1:], lambda b, l: (l, 0, 0))

    layer_args = [
        vec3(blocks["ln1_g"]), vec3(blocks["ln1_b"]),
        blocks["qkv_w"].astype(jnp.bfloat16),
        blocks["proj_w"].astype(jnp.bfloat16),
        vec3(blocks["proj_b"]),
        vec3(blocks["ln2_g"]), vec3(blocks["ln2_b"]),
        blocks["fc1_w"].astype(jnp.bfloat16),
        vec3(blocks["fc1_b"]),
        blocks["fc2_w"].astype(jnp.bfloat16),
        vec3(blocks["fc2_b"]),
    ]
    layer_specs = [lspec(a) for a in layer_args]

    args = ([feats_bne.astype(jnp.float32),
             pos.reshape(1, NP, E).astype(jnp.float32),
             rf_emb.astype(jnp.float32),
             gsd_emb.astype(jnp.float32)]
            + layer_args
            + [head_w.astype(jnp.bfloat16),
               head_b.reshape(1, PP).astype(jnp.float32)])

    in_specs = ([pl.BlockSpec((1, N, E), lambda b, l: (b, 0, 0)),
                 pl.BlockSpec((1, NP, E), lambda b, l: (0, 0, 0)),
                 pl.BlockSpec((1, C, E), lambda b, l: (b, 0, 0)),
                 pl.BlockSpec((1, C, E), lambda b, l: (b, 0, 0))]
                + layer_specs
                + [pl.BlockSpec((E, PP), lambda b, l: (0, 0)),
                   pl.BlockSpec((1, PP), lambda b, l: (0, 0))])

    kernel = _make_decoder_kernel(C, NP, E, H, PP, cfg.get("use_tanh_gelu", True))

    return pl.pallas_call(
        kernel,
        out_shape=jax.ShapeDtypeStruct((B, N, PP), jnp.float32),
        grid=(B, L),
        in_specs=in_specs,
        out_specs=pl.BlockSpec((1, N, PP), lambda b, l: (b, 0, 0)),
        scratch_shapes=[pltpu.VMEM((N, E), jnp.float32),     # activation carry
                        pltpu.VMEM((N, E), jnp.bfloat16)],   # per-head attention out
        compiler_params=pltpu.CompilerParams(
            dimension_semantics=("parallel", "arbitrary"),
            vmem_limit_bytes=_decoder_vmem_limit(N, NP, C, E, PP)),
    )(*args)


# ------------------------------------------------------------------------- forward

def take_indexes(sequences, indexes):
    # gather along dim 0: out[t, b, :] = sequences[indexes[t, b], b, :]
    return jnp.take_along_axis(sequences, indexes[:, :, None], axis=0)


def decoder_forward(params, features, rf, gsd, backward_indexes, cfg):
    T, B, E = features.shape
    C = cfg["num_channels"]
    P = cfg["patch_size"]
    SQ = cfg["sqrt_num_patches"]
    Ntok = backward_indexes.shape[0]          # == C * num_patches

    # append mask tokens + un-shuffle (host-side gather; no clean Pallas equivalent)
    mask_tok = jnp.broadcast_to(params["mask_token"], (Ntok - T, B, E))
    feats = jnp.concatenate([features, mask_tok], axis=0)            # (Ntok, B, E)
    feats = take_indexes(feats, backward_indexes)                    # '(c t) b e'
    feats = feats.transpose(1, 0, 2)                                 # (B, Ntok, E)

    # fused sensor-parameter encoders (one pallas_call each)
    rf_layers = [(params["rf"][f"w{i}"], params["rf"][f"b{i}"], "relu")
                 for i in range(5)]
    gsd_layers = [(params["gsd"][f"w{i}"], params["gsd"][f"b{i}"],
                   "relu" if i < 4 else "none") for i in range(5)]
    rf_emb = fused_mlp(rf.reshape(B * C, rf.shape[-1]), rf_layers).reshape(B, C, E)
    gsd_emb = fused_mlp(gsd.reshape(B * C, 1), gsd_layers).reshape(B, C, E)

    # fused decoder body: broadcast-add + all ViT blocks + head; grid=(B, L)
    patches = decoder_body(feats, params["pos_embedding"], rf_emb, gsd_emb,
                           params["blocks"], params["head_w"], params["head_b"], cfg)
    patches = patches.transpose(1, 0, 2)                             # (Ntok, B, P*P)

    # mask: zeros; mask[T:]=1; take_indexes(...)  ==  (backward_indexes >= T)
    mask = (backward_indexes >= T).astype(jnp.float32)[:, :, None]
    mask = jnp.broadcast_to(mask, patches.shape)

    def patch2img(x):
        # '(c h w) b (p1 p2) -> b c (h p1) (w p2)'
        x = x.reshape(C, SQ, SQ, B, P, P)
        x = x.transpose(3, 0, 1, 4, 2, 5)
        return x.reshape(B, C, SQ * P, SQ * P)

    return patch2img(patches), patch2img(mask)


# -------------------------------------------------------------------------- params

def init_params(key, cfg):
    E = cfg["emb_dim"]
    P = cfg["patch_size"]
    NP = cfg["num_patches"]
    L = cfg["num_layer"]
    keys = jax.random.split(key, 64)
    ki = iter(keys)

    def w(shape, std=0.02):
        return jax.random.normal(next(ki), shape, jnp.float32) * std

    def mlp(dims):
        d = {}
        for i in range(len(dims) - 1):
            d[f"w{i}"] = w((dims[i], dims[i + 1]))
            d[f"b{i}"] = jnp.zeros((dims[i + 1],), jnp.float32)
        return d

    # per-layer weights stacked along a leading L axis (streamed over the grid)
    blocks = dict(
        ln1_g=jnp.ones((L, E), jnp.float32), ln1_b=jnp.zeros((L, E), jnp.float32),
        qkv_w=w((L, E, 3 * E)),                        # timm default qkv_bias=False
        proj_w=w((L, E, E)), proj_b=jnp.zeros((L, E), jnp.float32),
        ln2_g=jnp.ones((L, E), jnp.float32), ln2_b=jnp.zeros((L, E), jnp.float32),
        fc1_w=w((L, E, 4 * E)), fc1_b=jnp.zeros((L, 4 * E), jnp.float32),
        fc2_w=w((L, 4 * E, E)), fc2_b=jnp.zeros((L, E), jnp.float32),
    )

    return dict(
        mask_token=w((1, 1, E)),                 # trunc_normal_(std=0.02) surrogate
        pos_embedding=w((1, 1, NP, E)),          # trunc_normal_(std=0.02) surrogate
        head_w=w((E, P * P)),
        head_b=jnp.zeros((P * P,), jnp.float32),
        rf=mlp([2301, 2 * E, E, E, E, E]),       # SensorParameterEncoding_Responsefunction
        gsd=mlp([1, E // 2, E, 2 * E, E, E]),    # SensorParameterEncoding_GSD
        blocks=blocks,
    )


# ---------------------------------------------------------------------------- main

if __name__ == "__main__":
    cfg = dict(image_size=8, patch_size=4, emb_dim=32, num_layer=2, num_head=4,
               num_channels=2,
               use_tanh_gelu=True)   # set False for exact-erf parity with PyTorch
    cfg["num_patches"] = (cfg["image_size"] // cfg["patch_size"]) ** 2   # 4
    cfg["sqrt_num_patches"] = int(cfg["num_patches"] ** 0.5)             # 2

    B = 2
    E = cfg["emb_dim"]
    C = cfg["num_channels"]
    Ntok = C * cfg["num_patches"]    # 8 total tokens
    T = 5                            # visible (unmasked) tokens

    key = jax.random.PRNGKey(0)
    k_par, k_feat, k_rf, k_gsd, k_perm = jax.random.split(key, 5)

    params = init_params(k_par, cfg)
    features = jax.random.normal(k_feat, (T, B, E), jnp.float32)
    rf = jax.random.normal(k_rf, (B, C, 2301), jnp.float32)
    gsd = jax.random.uniform(k_gsd, (B, C), jnp.float32, 0.5, 10.0)
    perm_keys = jax.random.split(k_perm, B)
    backward_indexes = jnp.stack(
        [jax.random.permutation(pk, Ntok) for pk in perm_keys], axis=1
    ).astype(jnp.int32)                                                   # (Ntok, B)

    fwd = jax.jit(lambda p, f, r, g, bi: decoder_forward(p, f, r, g, bi, cfg))
    img, mask = fwd(params, features, rf, gsd, backward_indexes)
    jax.block_until_ready((img, mask))

    assert img.shape == (B, C, cfg["image_size"], cfg["image_size"])
    assert mask.shape == (B, C, cfg["image_size"], cfg["image_size"])
    assert img.dtype == jnp.float32 and mask.dtype == jnp.float32
    assert bool(jnp.all(jnp.isfinite(img))) and bool(jnp.all(jnp.isfinite(mask)))
    print("KERNEL_OK")
</pallas_src>

<mosaic_0001>
module attributes {stable_mosaic.version = 11 : i64} {
  func.func @kernel(%arg0: i32, %arg1: memref<4x2301xf32, #tpu.memory_space<vmem>>, %arg2: memref<2301x64xbf16, #tpu.memory_space<vmem>>, %arg3: memref<1x64xf32, #tpu.memory_space<vmem>>, %arg4: memref<64x32xbf16, #tpu.memory_space<vmem>>, %arg5: memref<1x32xf32, #tpu.memory_space<vmem>>, %arg6: memref<32x32xbf16, #tpu.memory_space<vmem>>, %arg7: memref<1x32xf32, #tpu.memory_space<vmem>>, %arg8: memref<32x32xbf16, #tpu.memory_space<vmem>>, %arg9: memref<1x32xf32, #tpu.memory_space<vmem>>, %arg10: memref<32x32xbf16, #tpu.memory_space<vmem>>, %arg11: memref<1x32xf32, #tpu.memory_space<vmem>>, %arg12: memref<4x32xf32, #tpu.memory_space<vmem>>) attributes {dimension_semantics = [#tpu.dimension_semantics<arbitrary>], iteration_bounds = array<i64: 1>, scalar_prefetch = 0 : i64, scratch_operands = 0 : i64, tpu.core_type = #tpu.core_type<tc>, window_params = [{pipeline_mode = #tpu.pipeline_mode<synchronous>, transform_indices = @transform_0, window_bounds = array<i64: 4, 2301>}, {pipeline_mode = #tpu.pipeline_mode<synchronous>, transform_indices = @transform_1, window_bounds = array<i64: 2301, 64>}, {pipeline_mode = #tpu.pipeline_mode<synchronous>, transform_indices = @transform_2, window_bounds = array<i64: 1, 64>}, {pipeline_mode = #tpu.pipeline_mode<synchronous>, transform_indices = @transform_3, window_bounds = array<i64: 64, 32>}, {pipeline_mode = #tpu.pipeline_mode<synchronous>, transform_indices = @transform_4, window_bounds = array<i64: 1, 32>}, {pipeline_mode = #tpu.pipeline_mode<synchronous>, transform_indices = @transform_5, window_bounds = array<i64: 32, 32>}, {pipeline_mode = #tpu.pipeline_mode<synchronous>, transform_indices = @transform_6, window_bounds = array<i64: 1, 32>}, {pipeline_mode = #tpu.pipeline_mode<synchronous>, transform_indices = @transform_7, window_bounds = array<i64: 32, 32>}, {pipeline_mode = #tpu.pipeline_mode<synchronous>, transform_indices = @transform_8, window_bounds = array<i64: 1, 32>}, {pipeline_mode = #tpu.pipeline_mode<synchronous>, transform_indices = @transform_9, window_bounds = array<i64: 32, 32>}, {pipeline_mode = #tpu.pipeline_mode<synchronous>, transform_indices = @transform_10, window_bounds = array<i64: 1, 32>}, {pipeline_mode = #tpu.pipeline_mode<synchronous>, transform_indices = @transform_11, window_bounds = array<i64: 4, 32>}]} {
    %c0 = arith.constant 0 : index
    %c0_0 = arith.constant 0 : index
    %0 = vector.load %arg1[%c0, %c0_0] : memref<4x2301xf32, #tpu.memory_space<vmem>>, vector<4x2301xf32>
    %1 = arith.truncf %0 : vector<4x2301xf32> to vector<4x2301xbf16>
    %c0_1 = arith.constant 0 : index
    %c0_2 = arith.constant 0 : index
    %2 = vector.load %arg2[%c0_1, %c0_2] : memref<2301x64xbf16, #tpu.memory_space<vmem>>, vector<2301x64xbf16>
    %cst = arith.constant dense<0.000000e+00> : vector<4x64xf32>
    %3 = tpu.matmul %1, %2, %cst {dimension_numbers = #tpu.dot_dimension_numbers<[1], [0], [0], [1], [0, 0, 1, 1], [], []>} : vector<4x2301xbf16>, vector<2301x64xbf16>, vector<4x64xf32> -> vector<4x64xf32>
    %c0_3 = arith.constant 0 : index
    %c0_4 = arith.constant 0 : index
    %4 = vector.load %arg3[%c0_3, %c0_4] : memref<1x64xf32, #tpu.memory_space<vmem>>, vector<1x64xf32>
    %5 = vector.broadcast %4 : vector<1x64xf32> to vector<4x64xf32>
    %6 = arith.addf %3, %5 : vector<4x64xf32>
    %cst_5 = arith.constant 0.000000e+00 : f32
    %7 = vector.broadcast %cst_5 : f32 to vector<4x64xf32>
    %8 = arith.maximumf %6, %7 : vector<4x64xf32>
    %9 = arith.truncf %8 : vector<4x64xf32> to vector<4x64xbf16>
    %c0_6 = arith.constant 0 : index
    %c0_7 = arith.constant 0 : index
    %10 = vector.load %arg4[%c0_6, %c0_7] : memref<64x32xbf16, #tpu.memory_space<vmem>>, vector<64x32xbf16>
    %cst_8 = arith.constant dense<0.000000e+00> : vector<4x32xf32>
    %11 = tpu.matmul %9, %10, %cst_8 {dimension_numbers = #tpu.dot_dimension_numbers<[1], [0], [0], [1], [0, 0, 1, 1], [], []>} : vector<4x64xbf16>, vector<64x32xbf16>, vector<4x32xf32> -> vector<4x32xf32>
    %c0_9 = arith.constant 0 : index
    %c0_10 = arith.constant 0 : index
    %12 = vector.load %arg5[%c0_9, %c0_10] : memref<1x32xf32, #tpu.memory_space<vmem>>, vector<1x32xf32>
    %13 = vector.broadcast %12 : vector<1x32xf32> to vector<4x32xf32>
    %14 = arith.addf %11, %13 : vector<4x32xf32>
    %cst_11 = arith.constant 0.000000e+00 : f32
    %15 = vector.broadcast %cst_11 : f32 to vector<4x32xf32>
    %16 = arith.maximumf %14, %15 : vector<4x32xf32>
    %17 = arith.truncf %16 : vector<4x32xf32> to vector<4x32xbf16>
    %c0_12 = arith.constant 0 : index
    %c0_13 = arith.constant 0 : index
    %18 = vector.load %arg6[%c0_12, %c0_13] : memref<32x32xbf16, #tpu.memory_space<vmem>>, vector<32x32xbf16>
    %cst_14 = arith.constant dense<0.000000e+00> : vector<4x32xf32>
    %19 = tpu.matmul %17, %18, %cst_14 {dimension_numbers = #tpu.dot_dimension_numbers<[1], [0], [0], [1], [0, 0, 1, 1], [], []>} : vector<4x32xbf16>, vector<32x32xbf16>, vector<4x32xf32> -> vector<4x32xf32>
    %c0_15 = arith.constant 0 : index
    %c0_16 = arith.constant 0 : index
    %20 = vector.load %arg7[%c0_15, %c0_16] : memref<1x32xf32, #tpu.memory_space<vmem>>, vector<1x32xf32>
    %21 = vector.broadcast %20 : vector<1x32xf32> to vector<4x32xf32>
    %22 = arith.addf %19, %21 : vector<4x32xf32>
    %cst_17 = arith.constant 0.000000e+00 : f32
    %23 = vector.broadcast %cst_17 : f32 to vector<4x32xf32>
    %24 = arith.maximumf %22, %23 : vector<4x32xf32>
    %25 = arith.truncf %24 : vector<4x32xf32> to vector<4x32xbf16>
    %c0_18 = arith.constant 0 : index
    %c0_19 = arith.constant 0 : index
    %26 = vector.load %arg8[%c0_18, %c0_19] : memref<32x32xbf16, #tpu.memory_space<vmem>>, vector<32x32xbf16>
    %cst_20 = arith.constant dense<0.000000e+00> : vector<4x32xf32>
    %27 = tpu.matmul %25, %26, %cst_20 {dimension_numbers = #tpu.dot_dimension_numbers<[1], [0], [0], [1], [0, 0, 1, 1], [], []>} : vector<4x32xbf16>, vector<32x32xbf16>, vector<4x32xf32> -> vector<4x32xf32>
    %c0_21 = arith.constant 0 : index
    %c0_22 = arith.constant 0 : index
    %28 = vector.load %arg9[%c0_21, %c0_22] : memref<1x32xf32, #tpu.memory_space<vmem>>, vector<1x32xf32>
    %29 = vector.broadcast %28 : vector<1x32xf32> to vector<4x32xf32>
    %30 = arith.addf %27, %29 : vector<4x32xf32>
    %cst_23 = arith.constant 0.000000e+00 : f32
    %31 = vector.broadcast %cst_23 : f32 to vector<4x32xf32>
    %32 = arith.maximumf %30, %31 : vector<4x32xf32>
    %33 = arith.truncf %32 : vector<4x32xf32> to vector<4x32xbf16>
    %c0_24 = arith.constant 0 : index
    %c0_25 = arith.constant 0 : index
    %34 = vector.load %arg10[%c0_24, %c0_25] : memref<32x32xbf16, #tpu.memory_space<vmem>>, vector<32x32xbf16>
    %cst_26 = arith.constant dense<0.000000e+00> : vector<4x32xf32>
    %35 = tpu.matmul %33, %34, %cst_26 {dimension_numbers = #tpu.dot_dimension_numbers<[1], [0], [0], [1], [0, 0, 1, 1], [], []>} : vector<4x32xbf16>, vector<32x32xbf16>, vector<4x32xf32> -> vector<4x32xf32>
    %c0_27 = arith.constant 0 : index
    %c0_28 = arith.constant 0 : index
    %36 = vector.load %arg11[%c0_27, %c0_28] : memref<1x32xf32, #tpu.memory_space<vmem>>, vector<1x32xf32>
    %37 = vector.broadcast %36 : vector<1x32xf32> to vector<4x32xf32>
    %38 = arith.addf %35, %37 : vector<4x32xf32>
    %cst_29 = arith.constant 0.000000e+00 : f32
    %39 = vector.broadcast %cst_29 : f32 to vector<4x32xf32>
    %40 = arith.maximumf %38, %39 : vector<4x32xf32>
    %c0_30 = arith.constant 0 : index
    %c0_31 = arith.constant 0 : index
    %41 = vector.load %arg12[%c0_30, %c0_31] : memref<4x32xf32, #tpu.memory_space<vmem>>, vector<4x32xf32>
    tpu.vector_store %arg12[%c0_30, %c0_31], %40 {strides = array<i32>} : memref<4x32xf32, #tpu.memory_space<vmem>>, vector<4x32xf32>,
    return
  }
  func.func @transform_0(%arg0: i32) -> (i32, i32) {
    %c0_i32 = arith.constant 0 : i32
    %c0_i32_0 = arith.constant 0 : i32
    %c0_i32_1 = arith.constant 0 : i32
    return %c0_i32, %c0_i32_0 : i32, i32
  }
  func.func @transform_1(%arg0: i32) -> (i32, i32) {
    %c0_i32 = arith.constant 0 : i32
    %c0_i32_0 = arith.constant 0 : i32
    %c0_i32_1 = arith.constant 0 : i32
    return %c0_i32, %c0_i32_0 : i32, i32
  }
  func.func @transform_2(%arg0: i32) -> (i32, i32) {
    %c0_i32 = arith.constant 0 : i32
    %c0_i32_0 = arith.constant 0 : i32
    %c0_i32_1 = arith.constant 0 : i32
    return %c0_i32, %c0_i32_0 : i32, i32
  }
  func.func @transform_3(%arg0: i32) -> (i32, i32) {
    %c0_i32 = arith.constant 0 : i32
    %c0_i32_0 = arith.constant 0 : i32
    %c0_i32_1 = arith.constant 0 : i32
    return %c0_i32, %c0_i32_0 : i32, i32
  }
  func.func @transform_4(%arg0: i32) -> (i32, i32) {
    %c0_i32 = arith.constant 0 : i32
    %c0_i32_0 = arith.constant 0 : i32
    %c0_i32_1 = arith.constant 0 : i32
    return %c0_i32, %c0_i32_0 : i32, i32
  }
  func.func @transform_5(%arg0: i32) -> (i32, i32) {
    %c0_i32 = arith.constant 0 : i32
    %c0_i32_0 = arith.constant 0 : i32
    %c0_i32_1 = arith.constant 0 : i32
    return %c0_i32, %c0_i32_0 : i32, i32
  }
  func.func @transform_6(%arg0: i32) -> (i32, i32) {
    %c0_i32 = arith.constant 0 : i32
    %c0_i32_0 = arith.constant 0 : i32
    %c0_i32_1 = arith.constant 0 : i32
    return %c0_i32, %c0_i32_0 : i32, i32
  }
  func.func @transform_7(%arg0: i32) -> (i32, i32) {
    %c0_i32 = arith.constant 0 : i32
    %c0_i32_0 = arith.constant 0 : i32
    %c0_i32_1 = arith.constant 0 : i32
    return %c0_i32, %c0_i32_0 : i32, i32
  }
  func.func @transform_8(%arg0: i32) -> (i32, i32) {
    %c0_i32 = arith.constant 0 : i32
    %c0_i32_0 = arith.constant 0 : i32
    %c0_i32_1 = arith.constant 0 : i32
    return %c0_i32, %c0_i32_0 : i32, i32
  }
  func.func @transform_9(%arg0: i32) -> (i32, i32) {
    %c0_i32 = arith.constant 0 : i32
    %c0_i32_0 = arith.constant 0 : i32
    %c0_i32_1 = arith.constant 0 : i32
    return %c0_i32, %c0_i32_0 : i32, i32
  }
  func.func @transform_10(%arg0: i32) -> (i32, i32) {
    %c0_i32 = arith.constant 0 : i32
    %c0_i32_0 = arith.constant 0 : i32
    %c0_i32_1 = arith.constant 0 : i32
    return %c0_i32, %c0_i32_0 : i32, i32
  }
  func.func @transform_11(%arg0: i32) -> (i32, i32) {
    %c0_i32 = arith.constant 0 : i32
    %c0_i32_0 = arith.constant 0 : i32
    %c0_i32_1 = arith.constant 0 : i32
    return %c0_i32, %c0_i32_0 : i32, i32
  }
}

module attributes {stable_mosaic.version = 11 : i64} {
  func.func @kernel(%arg0: i32, %arg1: memref<4x1xf32, #tpu.memory_space<vmem>>, %arg2: memref<1x16xbf16, #tpu.memory_space<vmem>>, %arg3: memref<1x16xf32, #tpu.memory_space<vmem>>, %arg4: memref<16x32xbf16, #tpu.memory_space<vmem>>, %arg5: memref<1x32xf32, #tpu.memory_space<vmem>>, %arg6: memref<32x64xbf16, #tpu.memory_space<vmem>>, %arg7: memref<1x64xf32, #tpu.memory_space<vmem>>, %arg8: memref<64x32xbf16, #tpu.memory_space<vmem>>, %arg9: memref<1x32xf32, #tpu.memory_space<vmem>>, %arg10: memref<32x32xbf16, #tpu.memory_space<vmem>>, %arg11: memref<1x32xf32, #tpu.memory_space<vmem>>, %arg12: memref<4x32xf32, #tpu.memory_space<vmem>>) attributes {dimension_semantics = [#tpu.dimension_semantics<arbitrary>], iteration_bounds = array<i64: 1>, scalar_prefetch = 0 : i64, scratch_operands = 0 : i64, tpu.core_type = #tpu.core_type<tc>, window_params = [{pipeline_mode = #tpu.pipeline_mode<synchronous>, transform_indices = @transform_0, window_bounds = array<i64: 4, 1>}, {pipeline_mode = #tpu.pipeline_mode<synchronous>, transform_indices = @transform_1, window_bounds = array<i64: 1, 16>}, {pipeline_mode = #tpu.pipeline_mode<synchronous>, transform_indices = @transform_2, window_bounds = array<i64: 1, 16>}, {pipeline_mode = #tpu.pipeline_mode<synchronous>, transform_indices = @transform_3, window_bounds = array<i64: 16, 32>}, {pipeline_mode = #tpu.pipeline_mode<synchronous>, transform_indices = @transform_4, window_bounds = array<i64: 1, 32>}, {pipeline_mode = #tpu.pipeline_mode<synchronous>, transform_indices = @transform_5, window_bounds = array<i64: 32, 64>}, {pipeline_mode = #tpu.pipeline_mode<synchronous>, transform_indices = @transform_6, window_bounds = array<i64: 1, 64>}, {pipeline_mode = #tpu.pipeline_mode<synchronous>, transform_indices = @transform_7, window_bounds = array<i64: 64, 32>}, {pipeline_mode = #tpu.pipeline_mode<synchronous>, transform_indices = @transform_8, window_bounds = array<i64: 1, 32>}, {pipeline_mode = #tpu.pipeline_mode<synchronous>, transform_indices = @transform_9, window_bounds = array<i64: 32, 32>}, {pipeline_mode = #tpu.pipeline_mode<synchronous>, transform_indices = @transform_10, window_bounds = array<i64: 1, 32>}, {pipeline_mode = #tpu.pipeline_mode<synchronous>, transform_indices = @transform_11, window_bounds = array<i64: 4, 32>}]} {
    %c0 = arith.constant 0 : index
    %c0_0 = arith.constant 0 : index
    %0 = vector.load %arg1[%c0, %c0_0] : memref<4x1xf32, #tpu.memory_space<vmem>>, vector<4x1xf32>
    %1 = arith.truncf %0 : vector<4x1xf32> to vector<4x1xbf16>
    %c0_1 = arith.constant 0 : index
    %c0_2 = arith.constant 0 : index
    %2 = vector.load %arg2[%c0_1, %c0_2] : memref<1x16xbf16, #tpu.memory_space<vmem>>, vector<1x16xbf16>
    %cst = arith.constant dense<0.000000e+00> : vector<4x16xf32>
    %3 = tpu.matmul %1, %2, %cst {dimension_numbers = #tpu.dot_dimension_numbers<[1], [0], [0], [1], [0, 0, 1, 1], [], []>} : vector<4x1xbf16>, vector<1x16xbf16>, vector<4x16xf32> -> vector<4x16xf32>
    %c0_3 = arith.constant 0 : index
    %c0_4 = arith.constant 0 : index
    %4 = vector.load %arg3[%c0_3, %c0_4] : memref<1x16xf32, #tpu.memory_space<vmem>>, vector<1x16xf32>
    %5 = vector.broadcast %4 : vector<1x16xf32> to vector<4x16xf32>
    %6 = arith.addf %3, %5 : vector<4x16xf32>
    %cst_5 = arith.constant 0.000000e+00 : f32
    %7 = vector.broadcast %cst_5 : f32 to vector<4x16xf32>
    %8 = arith.maximumf %6, %7 : vector<4x16xf32>
    %9 = arith.truncf %8 : vector<4x16xf32> to vector<4x16xbf16>
    %c0_6 = arith.constant 0 : index
    %c0_7 = arith.constant 0 : index
    %10 = vector.load %arg4[%c0_6, %c0_7] : memref<16x32xbf16, #tpu.memory_space<vmem>>, vector<16x32xbf16>
    %cst_8 = arith.constant dense<0.000000e+00> : vector<4x32xf32>
    %11 = tpu.matmul %9, %10, %cst_8 {dimension_numbers = #tpu.dot_dimension_numbers<[1], [0], [0], [1], [0, 0, 1, 1], [], []>} : vector<4x16xbf16>, vector<16x32xbf16>, vector<4x32xf32> -> vector<4x32xf32>
    %c0_9 = arith.constant 0 : index
    %c0_10 = arith.constant 0 : index
    %12 = vector.load %arg5[%c0_9, %c0_10] : memref<1x32xf32, #tpu.memory_space<vmem>>, vector<1x32xf32>
    %13 = vector.broadcast %12 : vector<1x32xf32> to vector<4x32xf32>
    %14 = arith.addf %11, %13 : vector<4x32xf32>
    %cst_11 = arith.constant 0.000000e+00 : f32
    %15 = vector.broadcast %cst_11 : f32 to vector<4x32xf32>
    %16 = arith.maximumf %14, %15 : vector<4x32xf32>
    %17 = arith.truncf %16 : vector<4x32xf32> to vector<4x32xbf16>
    %c0_12 = arith.constant 0 : index
    %c0_13 = arith.constant 0 : index
    %18 = vector.load %arg6[%c0_12, %c0_13] : memref<32x64xbf16, #tpu.memory_space<vmem>>, vector<32x64xbf16>
    %cst_14 = arith.constant dense<0.000000e+00> : vector<4x64xf32>
    %19 = tpu.matmul %17, %18, %cst_14 {dimension_numbers = #tpu.dot_dimension_numbers<[1], [0], [0], [1], [0, 0, 1, 1], [], []>} : vector<4x32xbf16>, vector<32x64xbf16>, vector<4x64xf32> -> vector<4x64xf32>
    %c0_15 = arith.constant 0 : index
    %c0_16 = arith.constant 0 : index
    %20 = vector.load %arg7[%c0_15, %c0_16] : memref<1x64xf32, #tpu.memory_space<vmem>>, vector<1x64xf32>
    %21 = vector.broadcast %20 : vector<1x64xf32> to vector<4x64xf32>
    %22 = arith.addf %19, %21 : vector<4x64xf32>
    %cst_17 = arith.constant 0.000000e+00 : f32
    %23 = vector.broadcast %cst_17 : f32 to vector<4x64xf32>
    %24 = arith.maximumf %22, %23 : vector<4x64xf32>
    %25 = arith.truncf %24 : vector<4x64xf32> to vector<4x64xbf16>
    %c0_18 = arith.constant 0 : index
    %c0_19 = arith.constant 0 : index
    %26 = vector.load %arg8[%c0_18, %c0_19] : memref<64x32xbf16, #tpu.memory_space<vmem>>, vector<64x32xbf16>
    %cst_20 = arith.constant dense<0.000000e+00> : vector<4x32xf32>
    %27 = tpu.matmul %25, %26, %cst_20 {dimension_numbers = #tpu.dot_dimension_numbers<[1], [0], [0], [1], [0, 0, 1, 1], [], []>} : vector<4x64xbf16>, vector<64x32xbf16>, vector<4x32xf32> -> vector<4x32xf32>
    %c0_21 = arith.constant 0 : index
    %c0_22 = arith.constant 0 : index
    %28 = vector.load %arg9[%c0_21, %c0_22] : memref<1x32xf32, #tpu.memory_space<vmem>>, vector<1x32xf32>
    %29 = vector.broadcast %28 : vector<1x32xf32> to vector<4x32xf32>
    %30 = arith.addf %27, %29 : vector<4x32xf32>
    %cst_23 = arith.constant 0.000000e+00 : f32
    %31 = vector.broadcast %cst_23 : f32 to vector<4x32xf32>
    %32 = arith.maximumf %30, %31 : vector<4x32xf32>
    %33 = arith.truncf %32 : vector<4x32xf32> to vector<4x32xbf16>
    %c0_24 = arith.constant 0 : index
    %c0_25 = arith.constant 0 : index
    %34 = vector.load %arg10[%c0_24, %c0_25] : memref<32x32xbf16, #tpu.memory_space<vmem>>, vector<32x32xbf16>
    %cst_26 = arith.constant dense<0.000000e+00> : vector<4x32xf32>
    %35 = tpu.matmul %33, %34, %cst_26 {dimension_numbers = #tpu.dot_dimension_numbers<[1], [0], [0], [1], [0, 0, 1, 1], [], []>} : vector<4x32xbf16>, vector<32x32xbf16>, vector<4x32xf32> -> vector<4x32xf32>
    %c0_27 = arith.constant 0 : index
    %c0_28 = arith.constant 0 : index
    %36 = vector.load %arg11[%c0_27, %c0_28] : memref<1x32xf32, #tpu.memory_space<vmem>>, vector<1x32xf32>
    %37 = vector.broadcast %36 : vector<1x32xf32> to vector<4x32xf32>
    %38 = arith.addf %35, %37 : vector<4x32xf32>
    %c0_29 = arith.constant 0 : index
    %c0_30 = arith.constant 0 : index
    %39 = vector.load %arg12[%c0_29, %c0_30] : memref<4x32xf32, #tpu.memory_space<vmem>>, vector<4x32xf32>
    tpu.vector_store %arg12[%c0_29, %c0_30], %38 {strides = array<i32>} : memref<4x32xf32, #tpu.memory_space<vmem>>, vector<4x32xf32>,
    return
  }
  func.func @transform_0(%arg0: i32) -> (i32, i32) {
    %c0_i32 = arith.constant 0 : i32
    %c0_i32_0 = arith.constant 0 : i32
    %c0_i32_1 = arith.constant 0 : i32
    return %c0_i32, %c0_i32_0 : i32, i32
  }
  func.func @transform_1(%arg0: i32) -> (i32, i32) {
    %c0_i32 = arith.constant 0 : i32
    %c0_i32_0 = arith.constant 0 : i32
    %c0_i32_1 = arith.constant 0 : i32
    return %c0_i32, %c0_i32_0 : i32, i32
  }
  func.func @transform_2(%arg0: i32) -> (i32, i32) {
    %c0_i32 = arith.constant 0 : i32
    %c0_i32_0 = arith.constant 0 : i32
    %c0_i32_1 = arith.constant 0 : i32
    return %c0_i32, %c0_i32_0 : i32, i32
  }
  func.func @transform_3(%arg0: i32) -> (i32, i32) {
    %c0_i32 = arith.constant 0 : i32
    %c0_i32_0 = arith.constant 0 : i32
    %c0_i32_1 = arith.constant 0 : i32
    return %c0_i32, %c0_i32_0 : i32, i32
  }
  func.func @transform_4(%arg0: i32) -> (i32, i32) {
    %c0_i32 = arith.constant 0 : i32
    %c0_i32_0 = arith.constant 0 : i32
    %c0_i32_1 = arith.constant 0 : i32
    return %c0_i32, %c0_i32_0 : i32, i32
  }
  func.func @transform_5(%arg0: i32) -> (i32, i32) {
    %c0_i32 = arith.constant 0 : i32
    %c0_i32_0 = arith.constant 0 : i32
    %c0_i32_1 = arith.constant 0 : i32
    return %c0_i32, %c0_i32_0 : i32, i32
  }
  func.func @transform_6(%arg0: i32) -> (i32, i32) {
    %c0_i32 = arith.constant 0 : i32
    %c0_i32_0 = arith.constant 0 : i32
    %c0_i32_1 = arith.constant 0 : i32
    return %c0_i32, %c0_i32_0 : i32, i32
  }
  func.func @transform_7(%arg0: i32) -> (i32, i32) {
    %c0_i32 = arith.constant 0 : i32
    %c0_i32_0 = arith.constant 0 : i32
    %c0_i32_1 = arith.constant 0 : i32
    return %c0_i32, %c0_i32_0 : i32, i32
  }
  func.func @transform_8(%arg0: i32) -> (i32, i32) {
    %c0_i32 = arith.constant 0 : i32
    %c0_i32_0 = arith.constant 0 : i32
    %c0_i32_1 = arith.constant 0 : i32
    return %c0_i32, %c0_i32_0 : i32, i32
  }
  func.func @transform_9(%arg0: i32) -> (i32, i32) {
    %c0_i32 = arith.constant 0 : i32
    %c0_i32_0 = arith.constant 0 : i32
    %c0_i32_1 = arith.constant 0 : i32
    return %c0_i32, %c0_i32_0 : i32, i32
  }
  func.func @transform_10(%arg0: i32) -> (i32, i32) {
    %c0_i32 = arith.constant 0 : i32
    %c0_i32_0 = arith.constant 0 : i32
    %c0_i32_1 = arith.constant 0 : i32
    return %c0_i32, %c0_i32_0 : i32, i32
  }
  func.func @transform_11(%arg0: i32) -> (i32, i32) {
    %c0_i32 = arith.constant 0 : i32
    %c0_i32_0 = arith.constant 0 : i32
    %c0_i32_1 = arith.constant 0 : i32
    return %c0_i32, %c0_i32_0 : i32, i32
  }
}

module attributes {stable_mosaic.version = 11 : i64} {
  func.func @kernel(%arg0: i32, %arg1: i32, %arg2: memref<1x8x32xf32, #tpu.memory_space<vmem>>, %arg3: memref<1x4x32xf32, #tpu.memory_space<vmem>>, %arg4: memref<1x2x32xf32, #tpu.memory_space<vmem>>, %arg5: memref<1x2x32xf32, #tpu.memory_space<vmem>>, %arg6: memref<1x1x32xf32, #tpu.memory_space<vmem>>, %arg7: memref<1x1x32xf32, #tpu.memory_space<vmem>>, %arg8: memref<1x32x96xbf16, #tpu.memory_space<vmem>>, %arg9: memref<1x32x32xbf16, #tpu.memory_space<vmem>>, %arg10: memref<1x1x32xf32, #tpu.memory_space<vmem>>, %arg11: memref<1x1x32xf32, #tpu.memory_space<vmem>>, %arg12: memref<1x1x32xf32, #tpu.memory_space<vmem>>, %arg13: memref<1x32x128xbf16, #tpu.memory_space<vmem>>, %arg14: memref<1x1x128xf32, #tpu.memory_space<vmem>>, %arg15: memref<1x128x32xbf16, #tpu.memory_space<vmem>>, %arg16: memref<1x1x32xf32, #tpu.memory_space<vmem>>, %arg17: memref<32x16xbf16, #tpu.memory_space<vmem>>, %arg18: memref<1x16xf32, #tpu.memory_space<vmem>>, %arg19: memref<1x8x16xf32, #tpu.memory_space<vmem>>, %arg20: memref<8x32xf32, #tpu.memory_space<vmem>>, %arg21: memref<8x32xbf16, #tpu.memory_space<vmem>>) attributes {dimension_semantics = [#tpu.dimension_semantics<parallel>, #tpu.dimension_semantics<arbitrary>], iteration_bounds = array<i64: 2, 2>, scalar_prefetch = 0 : i64, scratch_operands = 2 : i64, tpu.core_type = #tpu.core_type<tc>, window_params = [{transform_indices = @transform_0, window_bounds = array<i64: 1, 8, 32>}, {pipeline_mode = #tpu.pipeline_mode<synchronous>, transform_indices = @transform_1, window_bounds = array<i64: 1, 4, 32>}, {transform_indices = @transform_2, window_bounds = array<i64: 1, 2, 32>}, {transform_indices = @transform_3, window_bounds = array<i64: 1, 2, 32>}, {transform_indices = @transform_4, window_bounds = array<i64: 1, 1, 32>}, {transform_indices = @transform_5, window_bounds = array<i64: 1, 1, 32>}, {transform_indices = @transform_6, window_bounds = array<i64: 1, 32, 96>}, {transform_indices = @transform_7, window_bounds = array<i64: 1, 32, 32>}, {transform_indices = @transform_8, window_bounds = array<i64: 1, 1, 32>}, {transform_indices = @transform_9, window_bounds = array<i64: 1, 1, 32>}, {transform_indices = @transform_10, window_bounds = array<i64: 1, 1, 32>}, {transform_indices = @transform_11, window_bounds = array<i64: 1, 32, 128>}, {transform_indices = @transform_12, window_bounds = array<i64: 1, 1, 128>}, {transform_indices = @transform_13, window_bounds = array<i64: 1, 128, 32>}, {transform_indices = @transform_14, window_bounds = array<i64: 1, 1, 32>}, {pipeline_mode = #tpu.pipeline_mode<synchronous>, transform_indices = @transform_15, window_bounds = array<i64: 32, 16>}, {pipeline_mode = #tpu.pipeline_mode<synchronous>, transform_indices = @transform_16, window_bounds = array<i64: 1, 16>}, {transform_indices = @transform_17, window_bounds = array<i64: 1, 8, 16>}]} {
    %c0_i32 = arith.constant 0 : i32
    %0 = arith.cmpi eq, %arg1, %c0_i32 : i32
    %1 = arith.extui %0 : i1 to i32
    %c0_i32_0 = arith.constant 0 : i32
    %2 = arith.cmpi ne, %1, %c0_i32_0 : i32
    scf.if %2 {
      %c0_82 = arith.constant 0 : index
      %c0_83 = arith.constant 0 : index
      %c0_84 = arith.constant 0 : index
      %195 = vector.load %arg2[%c0_82, %c0_83, %c0_84] : memref<1x8x32xf32, #tpu.memory_space<vmem>>, vector<1x8x32xf32>
      %196 = vector.shape_cast %195 : vector<1x8x32xf32> to vector<8x32xf32>
      %c0_85 = arith.constant 0 : index
      %c0_86 = arith.constant 0 : index
      %c0_87 = arith.constant 0 : index
      %197 = vector.load %arg3[%c0_85, %c0_86, %c0_87] : memref<1x4x32xf32, #tpu.memory_space<vmem>>, vector<1x4x32xf32>
      %198 = vector.shape_cast %197 : vector<1x4x32xf32> to vector<4x32xf32>
      %c0_88 = arith.constant 0 : index
      %c0_89 = arith.constant 0 : index
      %c0_90 = arith.constant 0 : index
      %199 = vector.load %arg4[%c0_88, %c0_89, %c0_90] : memref<1x2x32xf32, #tpu.memory_space<vmem>>, vector<1x2x32xf32>
      %200 = vector.shape_cast %199 : vector<1x2x32xf32> to vector<2x32xf32>
      %c0_91 = arith.constant 0 : index
      %c0_92 = arith.constant 0 : index
      %c0_93 = arith.constant 0 : index
      %201 = vector.load %arg5[%c0_91, %c0_92, %c0_93] : memref<1x2x32xf32, #tpu.memory_space<vmem>>, vector<1x2x32xf32>
      %202 = vector.shape_cast %201 : vector<1x2x32xf32> to vector<2x32xf32>
      %203 = vector.extract_strided_slice %196 {offsets = [0, 0], sizes = [4, 32], strides = [1, 1]} : vector<8x32xf32> to vector<4x32xf32>
      %204 = arith.addf %203, %198 : vector<4x32xf32>
      %205 = vector.extract_strided_slice %200 {offsets = [0, 0], sizes = [1, 32], strides = [1, 1]} : vector<2x32xf32> to vector<1x32xf32>
      %206 = vector.broadcast %205 : vector<1x32xf32> to vector<4x32xf32>
      %207 = arith.addf %204, %206 : vector<4x32xf32>
      %208 = vector.extract_strided_slice %202 {offsets = [0, 0], sizes = [1, 32], strides = [1, 1]} : vector<2x32xf32> to vector<1x32xf32>
      %209 = vector.broadcast %208 : vector<1x32xf32> to vector<4x32xf32>
      %210 = arith.addf %207, %209 : vector<4x32xf32>
      %c0_94 = arith.constant 0 : index
      %c0_95 = arith.constant 0 : index
      %211 = vector.load %arg20[%c0_94, %c0_95] : memref<8x32xf32, #tpu.memory_space<vmem>>, vector<4x32xf32>
      tpu.vector_store %arg20[%c0_94, %c0_95], %210 {strides = array<i32>} : memref<8x32xf32, #tpu.memory_space<vmem>>, vector<4x32xf32>,
      %212 = vector.extract_strided_slice %196 {offsets = [4, 0], sizes = [4, 32], strides = [1, 1]} : vector<8x32xf32> to vector<4x32xf32>
      %213 = arith.addf %212, %198 : vector<4x32xf32>
      %214 = vector.extract_strided_slice %200 {offsets = [1, 0], sizes = [1, 32], strides = [1, 1]} : vector<2x32xf32> to vector<1x32xf32>
      %215 = vector.broadcast %214 : vector<1x32xf32> to vector<4x32xf32>
      %216 = arith.addf %213, %215 : vector<4x32xf32>
      %217 = vector.extract_strided_slice %202 {offsets = [1, 0], sizes = [1, 32], strides = [1, 1]} : vector<2x32xf32> to vector<1x32xf32>
      %218 = vector.broadcast %217 : vector<1x32xf32> to vector<4x32xf32>
      %219 = arith.addf %216, %218 : vector<4x32xf32>
      %c4 = arith.constant 4 : index
      %c0_96 = arith.constant 0 : index
      %220 = vector.load %arg20[%c4, %c0_96] : memref<8x32xf32, #tpu.memory_space<vmem>>, vector<4x32xf32>
      tpu.vector_store %arg20[%c4, %c0_96], %219 {strides = array<i32>} : memref<8x32xf32, #tpu.memory_space<vmem>>, vector<4x32xf32>,
    } else {
    }
    %c0 = arith.constant 0 : index
    %c0_1 = arith.constant 0 : index
    %3 = vector.load %arg20[%c0, %c0_1] : memref<8x32xf32, #tpu.memory_space<vmem>>, vector<8x32xf32>
    %c0_2 = arith.constant 0 : index
    %c0_3 = arith.constant 0 : index
    %c0_4 = arith.constant 0 : index
    %4 = vector.load %arg6[%c0_2, %c0_3, %c0_4] : memref<1x1x32xf32, #tpu.memory_space<vmem>>, vector<1x1x32xf32>
    %5 = vector.shape_cast %4 : vector<1x1x32xf32> to vector<1x32xf32>
    %c0_5 = arith.constant 0 : index
    %c0_6 = arith.constant 0 : index
    %c0_7 = arith.constant 0 : index
    %6 = vector.load %arg7[%c0_5, %c0_6, %c0_7] : memref<1x1x32xf32, #tpu.memory_space<vmem>>, vector<1x1x32xf32>
    %7 = vector.shape_cast %6 : vector<1x1x32xf32> to vector<1x32xf32>
    %cst = arith.constant dense<0.000000e+00> : vector<8xf32>
    %8 = vector.multi_reduction <add>, %3, %cst [1] : vector<8x32xf32> to vector<8xf32>
    %9 = vector.shape_cast %8 : vector<8xf32> to vector<8x1xf32>
    %cst_8 = arith.constant 3.200000e+01 : f32
    %10 = vector.broadcast %cst_8 : f32 to vector<8x1xf32>
    %11 = arith.divf %9, %10 : vector<8x1xf32>
    %12 = vector.broadcast %11 : vector<8x1xf32> to vector<8x32xf32>
    %13 = arith.subf %3, %12 : vector<8x32xf32>
    %14 = arith.mulf %13, %13 : vector<8x32xf32>
    %cst_9 = arith.constant dense<0.000000e+00> : vector<8xf32>
    %15 = vector.multi_reduction <add>, %14, %cst_9 [1] : vector<8x32xf32> to vector<8xf32>
    %16 = vector.shape_cast %15 : vector<8xf32> to vector<8x1xf32>
    %cst_10 = arith.constant 3.200000e+01 : f32
    %17 = vector.broadcast %cst_10 : f32 to vector<8x1xf32>
    %18 = arith.divf %16, %17 : vector<8x1xf32>
    %19 = vector.broadcast %11 : vector<8x1xf32> to vector<8x32xf32>
    %20 = arith.subf %3, %19 : vector<8x32xf32>
    %cst_11 = arith.constant 9.99999974E-6 : f32
    %21 = vector.broadcast %cst_11 : f32 to vector<8x1xf32>
    %22 = arith.addf %18, %21 : vector<8x1xf32>
    %23 = math.rsqrt %22 : vector<8x1xf32>
    %24 = vector.broadcast %23 : vector<8x1xf32> to vector<8x32xf32>
    %25 = arith.mulf %20, %24 : vector<8x32xf32>
    %26 = vector.broadcast %5 : vector<1x32xf32> to vector<8x32xf32>
    %27 = arith.mulf %25, %26 : vector<8x32xf32>
    %28 = vector.broadcast %7 : vector<1x32xf32> to vector<8x32xf32>
    %29 = arith.addf %27, %28 : vector<8x32xf32>
    %30 = arith.truncf %29 : vector<8x32xf32> to vector<8x32xbf16>
    %c0_12 = arith.constant 0 : index
    %c0_13 = arith.constant 0 : index
    %c0_14 = arith.constant 0 : index
    %31 = vector.load %arg8[%c0_12, %c0_13, %c0_14] : memref<1x32x96xbf16, #tpu.memory_space<vmem>>, vector<1x32x96xbf16>
    %32 = vector.shape_cast %31 : vector<1x32x96xbf16> to vector<32x96xbf16>
    %cst_15 = arith.constant dense<0.000000e+00> : vector<8x96xf32>
    %33 = tpu.matmul %30, %32, %cst_15 {dimension_numbers = #tpu.dot_dimension_numbers<[1], [0], [0], [1], [0, 0, 1, 1], [], []>} : vector<8x32xbf16>, vector<32x96xbf16>, vector<8x96xf32> -> vector<8x96xf32>
    %34 = vector.extract_strided_slice %33 {offsets = [0, 0], sizes = [8, 8], strides = [1, 1]} : vector<8x96xf32> to vector<8x8xf32>
    %35 = arith.truncf %34 : vector<8x8xf32> to vector<8x8xbf16>
    %36 = vector.extract_strided_slice %33 {offsets = [0, 32], sizes = [8, 8], strides = [1, 1]} : vector<8x96xf32> to vector<8x8xf32>
    %37 = arith.truncf %36 : vector<8x8xf32> to vector<8x8xbf16>
    %38 = vector.extract_strided_slice %33 {offsets = [0, 64], sizes = [8, 8], strides = [1, 1]} : vector<8x96xf32> to vector<8x8xf32>
    %39 = arith.truncf %38 : vector<8x8xf32> to vector<8x8xbf16>
    %cst_16 = arith.constant dense<0.000000e+00> : vector<8x8xf32>
    %40 = tpu.matmul %35, %37, %cst_16 {dimension_numbers = #tpu.dot_dimension_numbers<[1], [1], [0], [0], [0, 0, 1, 0], [], []>} : vector<8x8xbf16>, vector<8x8xbf16>, vector<8x8xf32> -> vector<8x8xf32>
    %cst_17 = arith.constant 0.353553385 : f32
    %41 = vector.broadcast %cst_17 : f32 to vector<8x8xf32>
    %42 = arith.mulf %40, %41 : vector<8x8xf32>
    %cst_18 = arith.constant dense<0xFF800000> : vector<8xf32>
    %43 = vector.multi_reduction <maximumf>, %42, %cst_18 [1] : vector<8x8xf32> to vector<8xf32>
    %44 = vector.shape_cast %43 : vector<8xf32> to vector<8x1xf32>
    %45 = vector.broadcast %44 : vector<8x1xf32> to vector<8x8xf32>
    %46 = arith.subf %42, %45 : vector<8x8xf32>
    %47 = math.exp %46 : vector<8x8xf32>
    %cst_19 = arith.constant dense<0.000000e+00> : vector<8xf32>
    %48 = vector.multi_reduction <add>, %47, %cst_19 [1] : vector<8x8xf32> to vector<8xf32>
    %49 = vector.shape_cast %48 : vector<8xf32> to vector<8x1xf32>
    %50 = tpu.reciprocal %49 {approx = true} : vector<8x1xf32> -> vector<8x1xf32>
    %51 = vector.broadcast %50 : vector<8x1xf32> to vector<8x8xf32>
    %52 = arith.mulf %47, %51 : vector<8x8xf32>
    %53 = arith.truncf %52 : vector<8x8xf32> to vector<8x8xbf16>
    %cst_20 = arith.constant dense<0.000000e+00> : vector<8x8xf32>
    %54 = tpu.matmul %53, %39, %cst_20 {dimension_numbers = #tpu.dot_dimension_numbers<[1], [0], [0], [1], [0, 0, 1, 1], [], []>} : vector<8x8xbf16>, vector<8x8xbf16>, vector<8x8xf32> -> vector<8x8xf32>
    %55 = arith.truncf %54 : vector<8x8xf32> to vector<8x8xbf16>
    %c0_21 = arith.constant 0 : index
    %c0_22 = arith.constant 0 : index
    %56 = vector.load %arg21[%c0_21, %c0_22] : memref<8x32xbf16, #tpu.memory_space<vmem>>, vector<8x8xbf16>
    tpu.vector_store %arg21[%c0_21, %c0_22], %55 {strides = array<i32>} : memref<8x32xbf16, #tpu.memory_space<vmem>>, vector<8x8xbf16>,
    %57 = vector.extract_strided_slice %33 {offsets = [0, 8], sizes = [8, 8], strides = [1, 1]} : vector<8x96xf32> to vector<8x8xf32>
    %58 = arith.truncf %57 : vector<8x8xf32> to vector<8x8xbf16>
    %59 = vector.extract_strided_slice %33 {offsets = [0, 40], sizes = [8, 8], strides = [1, 1]} : vector<8x96xf32> to vector<8x8xf32>
    %60 = arith.truncf %59 : vector<8x8xf32> to vector<8x8xbf16>
    %61 = vector.extract_strided_slice %33 {offsets = [0, 72], sizes = [8, 8], strides = [1, 1]} : vector<8x96xf32> to vector<8x8xf32>
    %62 = arith.truncf %61 : vector<8x8xf32> to vector<8x8xbf16>
    %cst_23 = arith.constant dense<0.000000e+00> : vector<8x8xf32>
    %63 = tpu.matmul %58, %60, %cst_23 {dimension_numbers = #tpu.dot_dimension_numbers<[1], [1], [0], [0], [0, 0, 1, 0], [], []>} : vector<8x8xbf16>, vector<8x8xbf16>, vector<8x8xf32> -> vector<8x8xf32>
    %cst_24 = arith.constant 0.353553385 : f32
    %64 = vector.broadcast %cst_24 : f32 to vector<8x8xf32>
    %65 = arith.mulf %63, %64 : vector<8x8xf32>
    %cst_25 = arith.constant dense<0xFF800000> : vector<8xf32>
    %66 = vector.multi_reduction <maximumf>, %65, %cst_25 [1] : vector<8x8xf32> to vector<8xf32>
    %67 = vector.shape_cast %66 : vector<8xf32> to vector<8x1xf32>
    %68 = vector.broadcast %67 : vector<8x1xf32> to vector<8x8xf32>
    %69 = arith.subf %65, %68 : vector<8x8xf32>
    %70 = math.exp %69 : vector<8x8xf32>
    %cst_26 = arith.constant dense<0.000000e+00> : vector<8xf32>
    %71 = vector.multi_reduction <add>, %70, %cst_26 [1] : vector<8x8xf32> to vector<8xf32>
    %72 = vector.shape_cast %71 : vector<8xf32> to vector<8x1xf32>
    %73 = tpu.reciprocal %72 {approx = true} : vector<8x1xf32> -> vector<8x1xf32>
    %74 = vector.broadcast %73 : vector<8x1xf32> to vector<8x8xf32>
    %75 = arith.mulf %70, %74 : vector<8x8xf32>
    %76 = arith.truncf %75 : vector<8x8xf32> to vector<8x8xbf16>
    %cst_27 = arith.constant dense<0.000000e+00> : vector<8x8xf32>
    %77 = tpu.matmul %76, %62, %cst_27 {dimension_numbers = #tpu.dot_dimension_numbers<[1], [0], [0], [1], [0, 0, 1, 1], [], []>} : vector<8x8xbf16>, vector<8x8xbf16>, vector<8x8xf32> -> vector<8x8xf32>
    %78 = arith.truncf %77 : vector<8x8xf32> to vector<8x8xbf16>
    %c0_28 = arith.constant 0 : index
    %c8 = arith.constant 8 : index
    %79 = vector.load %arg21[%c0_28, %c8] : memref<8x32xbf16, #tpu.memory_space<vmem>>, vector<8x8xbf16>
    tpu.vector_store %arg21[%c0_28, %c8], %78 {strides = array<i32>} : memref<8x32xbf16, #tpu.memory_space<vmem>>, vector<8x8xbf16>,
    %80 = vector.extract_strided_slice %33 {offsets = [0, 16], sizes = [8, 8], strides = [1, 1]} : vector<8x96xf32> to vector<8x8xf32>
    %81 = arith.truncf %80 : vector<8x8xf32> to vector<8x8xbf16>
    %82 = vector.extract_strided_slice %33 {offsets = [0, 48], sizes = [8, 8], strides = [1, 1]} : vector<8x96xf32> to vector<8x8xf32>
    %83 = arith.truncf %82 : vector<8x8xf32> to vector<8x8xbf16>
    %84 = vector.extract_strided_slice %33 {offsets = [0, 80], sizes = [8, 8], strides = [1, 1]} : vector<8x96xf32> to vector<8x8xf32>
    %85 = arith.truncf %84 : vector<8x8xf32> to vector<8x8xbf16>
    %cst_29 = arith.constant dense<0.000000e+00> : vector<8x8xf32>
    %86 = tpu.matmul %81, %83, %cst_29 {dimension_numbers = #tpu.dot_dimension_numbers<[1], [1], [0], [0], [0, 0, 1, 0], [], []>} : vector<8x8xbf16>, vector<8x8xbf16>, vector<8x8xf32> -> vector<8x8xf32>
    %cst_30 = arith.constant 0.353553385 : f32
    %87 = vector.broadcast %cst_30 : f32 to vector<8x8xf32>
    %88 = arith.mulf %86, %87 : vector<8x8xf32>
    %cst_31 = arith.constant dense<0xFF800000> : vector<8xf32>
    %89 = vector.multi_reduction <maximumf>, %88, %cst_31 [1] : vector<8x8xf32> to vector<8xf32>
    %90 = vector.shape_cast %89 : vector<8xf32> to vector<8x1xf32>
    %91 = vector.broadcast %90 : vector<8x1xf32> to vector<8x8xf32>
    %92 = arith.subf %88, %91 : vector<8x8xf32>
    %93 = math.exp %92 : vector<8x8xf32>
    %cst_32 = arith.constant dense<0.000000e+00> : vector<8xf32>
    %94 = vector.multi_reduction <add>, %93, %cst_32 [1] : vector<8x8xf32> to vector<8xf32>
    %95 = vector.shape_cast %94 : vector<8xf32> to vector<8x1xf32>
    %96 = tpu.reciprocal %95 {approx = true} : vector<8x1xf32> -> vector<8x1xf32>
    %97 = vector.broadcast %96 : vector<8x1xf32> to vector<8x8xf32>
    %98 = arith.mulf %93, %97 : vector<8x8xf32>
    %99 = arith.truncf %98 : vector<8x8xf32> to vector<8x8xbf16>
    %cst_33 = arith.constant dense<0.000000e+00> : vector<8x8xf32>
    %100 = tpu.matmul %99, %85, %cst_33 {dimension_numbers = #tpu.dot_dimension_numbers<[1], [0], [0], [1], [0, 0, 1, 1], [], []>} : vector<8x8xbf16>, vector<8x8xbf16>, vector<8x8xf32> -> vector<8x8xf32>
    %101 = arith.truncf %100 : vector<8x8xf32> to vector<8x8xbf16>
    %c0_34 = arith.constant 0 : index
    %c16 = arith.constant 16 : index
    %102 = vector.load %arg21[%c0_34, %c16] : memref<8x32xbf16, #tpu.memory_space<vmem>>, vector<8x8xbf16>
    tpu.vector_store %arg21[%c0_34, %c16], %101 {strides = array<i32>} : memref<8x32xbf16, #tpu.memory_space<vmem>>, vector<8x8xbf16>,
    %103 = vector.extract_strided_slice %33 {offsets = [0, 24], sizes = [8, 8], strides = [1, 1]} : vector<8x96xf32> to vector<8x8xf32>
    %104 = arith.truncf %103 : vector<8x8xf32> to vector<8x8xbf16>
    %105 = vector.extract_strided_slice %33 {offsets = [0, 56], sizes = [8, 8], strides = [1, 1]} : vector<8x96xf32> to vector<8x8xf32>
    %106 = arith.truncf %105 : vector<8x8xf32> to vector<8x8xbf16>
    %107 = vector.extract_strided_slice %33 {offsets = [0, 88], sizes = [8, 8], strides = [1, 1]} : vector<8x96xf32> to vector<8x8xf32>
    %108 = arith.truncf %107 : vector<8x8xf32> to vector<8x8xbf16>
    %cst_35 = arith.constant dense<0.000000e+00> : vector<8x8xf32>
    %109 = tpu.matmul %104, %106, %cst_35 {dimension_numbers = #tpu.dot_dimension_numbers<[1], [1], [0], [0], [0, 0, 1, 0], [], []>} : vector<8x8xbf16>, vector<8x8xbf16>, vector<8x8xf32> -> vector<8x8xf32>
    %cst_36 = arith.constant 0.353553385 : f32
    %110 = vector.broadcast %cst_36 : f32 to vector<8x8xf32>
    %111 = arith.mulf %109, %110 : vector<8x8xf32>
    %cst_37 = arith.constant dense<0xFF800000> : vector<8xf32>
    %112 = vector.multi_reduction <maximumf>, %111, %cst_37 [1] : vector<8x8xf32> to vector<8xf32>
    %113 = vector.shape_cast %112 : vector<8xf32> to vector<8x1xf32>
    %114 = vector.broadcast %113 : vector<8x1xf32> to vector<8x8xf32>
    %115 = arith.subf %111, %114 : vector<8x8xf32>
    %116 = math.exp %115 : vector<8x8xf32>
    %cst_38 = arith.constant dense<0.000000e+00> : vector<8xf32>
    %117 = vector.multi_reduction <add>, %116, %cst_38 [1] : vector<8x8xf32> to vector<8xf32>
    %118 = vector.shape_cast %117 : vector<8xf32> to vector<8x1xf32>
    %119 = tpu.reciprocal %118 {approx = true} : vector<8x1xf32> -> vector<8x1xf32>
    %120 = vector.broadcast %119 : vector<8x1xf32> to vector<8x8xf32>
    %121 = arith.mulf %116, %120 : vector<8x8xf32>
    %122 = arith.truncf %121 : vector<8x8xf32> to vector<8x8xbf16>
    %cst_39 = arith.constant dense<0.000000e+00> : vector<8x8xf32>
    %123 = tpu.matmul %122, %108, %cst_39 {dimension_numbers = #tpu.dot_dimension_numbers<[1], [0], [0], [1], [0, 0, 1, 1], [], []>} : vector<8x8xbf16>, vector<8x8xbf16>, vector<8x8xf32> -> vector<8x8xf32>
    %124 = arith.truncf %123 : vector<8x8xf32> to vector<8x8xbf16>
    %c0_40 = arith.constant 0 : index
    %c24 = arith.constant 24 : index
    %125 = vector.load %arg21[%c0_40, %c24] : memref<8x32xbf16, #tpu.memory_space<vmem>>, vector<8x8xbf16>
    tpu.vector_store %arg21[%c0_40, %c24], %124 {strides = array<i32>} : memref<8x32xbf16, #tpu.memory_space<vmem>>, vector<8x8xbf16>,
    %c0_41 = arith.constant 0 : index
    %c0_42 = arith.constant 0 : index
    %126 = vector.load %arg21[%c0_41, %c0_42] : memref<8x32xbf16, #tpu.memory_space<vmem>>, vector<8x32xbf16>
    %c0_43 = arith.constant 0 : index
    %c0_44 = arith.constant 0 : index
    %c0_45 = arith.constant 0 : index
    %127 = vector.load %arg9[%c0_43, %c0_44, %c0_45] : memref<1x32x32xbf16, #tpu.memory_space<vmem>>, vector<1x32x32xbf16>
    %128 = vector.shape_cast %127 : vector<1x32x32xbf16> to vector<32x32xbf16>
    %cst_46 = arith.constant dense<0.000000e+00> : vector<8x32xf32>
    %129 = tpu.matmul %126, %128, %cst_46 {dimension_numbers = #tpu.dot_dimension_numbers<[1], [0], [0], [1], [0, 0, 1, 1], [], []>} : vector<8x32xbf16>, vector<32x32xbf16>, vector<8x32xf32> -> vector<8x32xf32>
    %c0_47 = arith.constant 0 : index
    %c0_48 = arith.constant 0 : index
    %c0_49 = arith.constant 0 : index
    %130 = vector.load %arg10[%c0_47, %c0_48, %c0_49] : memref<1x1x32xf32, #tpu.memory_space<vmem>>, vector<1x1x32xf32>
    %131 = vector.shape_cast %130 : vector<1x1x32xf32> to vector<1x32xf32>
    %132 = vector.broadcast %131 : vector<1x32xf32> to vector<8x32xf32>
    %133 = arith.addf %129, %132 : vector<8x32xf32>
    %134 = arith.addf %3, %133 : vector<8x32xf32>
    %c0_50 = arith.constant 0 : index
    %c0_51 = arith.constant 0 : index
    %c0_52 = arith.constant 0 : index
    %135 = vector.load %arg11[%c0_50, %c0_51, %c0_52] : memref<1x1x32xf32, #tpu.memory_space<vmem>>, vector<1x1x32xf32>
    %136 = vector.shape_cast %135 : vector<1x1x32xf32> to vector<1x32xf32>
    %c0_53 = arith.constant 0 : index
    %c0_54 = arith.constant 0 : index
    %c0_55 = arith.constant 0 : index
    %137 = vector.load %arg12[%c0_53, %c0_54, %c0_55] : memref<1x1x32xf32, #tpu.memory_space<vmem>>, vector<1x1x32xf32>
    %138 = vector.shape_cast %137 : vector<1x1x32xf32> to vector<1x32xf32>
    %cst_56 = arith.constant dense<0.000000e+00> : vector<8xf32>
    %139 = vector.multi_reduction <add>, %134, %cst_56 [1] : vector<8x32xf32> to vector<8xf32>
    %140 = vector.shape_cast %139 : vector<8xf32> to vector<8x1xf32>
    %cst_57 = arith.constant 3.200000e+01 : f32
    %141 = vector.broadcast %cst_57 : f32 to vector<8x1xf32>
    %142 = arith.divf %140, %141 : vector<8x1xf32>
    %143 = vector.broadcast %142 : vector<8x1xf32> to vector<8x32xf32>
    %144 = arith.subf %134, %143 : vector<8x32xf32>
    %145 = arith.mulf %144, %144 : vector<8x32xf32>
    %cst_58 = arith.constant dense<0.000000e+00> : vector<8xf32>
    %146 = vector.multi_reduction <add>, %145, %cst_58 [1] : vector<8x32xf32> to vector<8xf32>
    %147 = vector.shape_cast %146 : vector<8xf32> to vector<8x1xf32>
    %cst_59 = arith.constant 3.200000e+01 : f32
    %148 = vector.broadcast %cst_59 : f32 to vector<8x1xf32>
    %149 = arith.divf %147, %148 : vector<8x1xf32>
    %150 = vector.broadcast %142 : vector<8x1xf32> to vector<8x32xf32>
    %151 = arith.subf %134, %150 : vector<8x32xf32>
    %cst_60 = arith.constant 9.99999974E-6 : f32
    %152 = vector.broadcast %cst_60 : f32 to vector<8x1xf32>
    %153 = arith.addf %149, %152 : vector<8x1xf32>
    %154 = math.rsqrt %153 : vector<8x1xf32>
    %155 = vector.broadcast %154 : vector<8x1xf32> to vector<8x32xf32>
    %156 = arith.mulf %151, %155 : vector<8x32xf32>
    %157 = vector.broadcast %136 : vector<1x32xf32> to vector<8x32xf32>
    %158 = arith.mulf %156, %157 : vector<8x32xf32>
    %159 = vector.broadcast %138 : vector<1x32xf32> to vector<8x32xf32>
    %160 = arith.addf %158, %159 : vector<8x32xf32>
    %161 = arith.truncf %160 : vector<8x32xf32> to vector<8x32xbf16>
    %c0_61 = arith.constant 0 : index
    %c0_62 = arith.constant 0 : index
    %c0_63 = arith.constant 0 : index
    %162 = vector.load %arg13[%c0_61, %c0_62, %c0_63] : memref<1x32x128xbf16, #tpu.memory_space<vmem>>, vector<1x32x128xbf16>
    %163 = vector.shape_cast %162 : vector<1x32x128xbf16> to vector<32x128xbf16>
    %cst_64 = arith.constant dense<0.000000e+00> : vector<8x128xf32>
    %164 = tpu.matmul %161, %163, %cst_64 {dimension_numbers = #tpu.dot_dimension_numbers<[1], [0], [0], [1], [0, 0, 1, 1], [], []>} : vector<8x32xbf16>, vector<32x128xbf16>, vector<8x128xf32> -> vector<8x128xf32>
    %c0_65 = arith.constant 0 : index
    %c0_66 = arith.constant 0 : index
    %c0_67 = arith.constant 0 : index
    %165 = vector.load %arg14[%c0_65, %c0_66, %c0_67] : memref<1x1x128xf32, #tpu.memory_space<vmem>>, vector<1x1x128xf32>
    %166 = vector.shape_cast %165 : vector<1x1x128xf32> to vector<1x128xf32>
    %167 = vector.broadcast %166 : vector<1x128xf32> to vector<8x128xf32>
    %168 = arith.addf %164, %167 : vector<8x128xf32>
    %169 = arith.mulf %168, %168 : vector<8x128xf32>
    %170 = arith.mulf %168, %169 : vector<8x128xf32>
    %cst_68 = arith.constant 4.471500e-02 : f32
    %171 = vector.broadcast %cst_68 : f32 to vector<8x128xf32>
    %172 = arith.mulf %171, %170 : vector<8x128xf32>
    %173 = arith.addf %168, %172 : vector<8x128xf32>
    %cst_69 = arith.constant 0.797884583 : f32
    %174 = vector.broadcast %cst_69 : f32 to vector<8x128xf32>
    %175 = arith.mulf %174, %173 : vector<8x128xf32>
    %176 = math.tanh %175 : vector<8x128xf32>
    %cst_70 = arith.constant 1.000000e+00 : f32
    %177 = vector.broadcast %cst_70 : f32 to vector<8x128xf32>
    %178 = arith.addf %177, %176 : vector<8x128xf32>
    %cst_71 = arith.constant 5.000000e-01 : f32
    %179 = vector.broadcast %cst_71 : f32 to vector<8x128xf32>
    %180 = arith.mulf %179, %178 : vector<8x128xf32>
    %181 = arith.mulf %168, %180 : vector<8x128xf32>
    %182 = arith.truncf %181 : vector<8x128xf32> to vector<8x128xbf16>
    %c0_72 = arith.constant 0 : index
    %c0_73 = arith.constant 0 : index
    %c0_74 = arith.constant 0 : index
    %183 = vector.load %arg15[%c0_72, %c0_73, %c0_74] : memref<1x128x32xbf16, #tpu.memory_space<vmem>>, vector<1x128x32xbf16>
    %184 = vector.shape_cast %183 : vector<1x128x32xbf16> to vector<128x32xbf16>
    %cst_75 = arith.constant dense<0.000000e+00> : vector<8x32xf32>
    %185 = tpu.matmul %182, %184, %cst_75 {dimension_numbers = #tpu.dot_dimension_numbers<[1], [0], [0], [1], [0, 0, 1, 1], [], []>} : vector<8x128xbf16>, vector<128x32xbf16>, vector<8x32xf32> -> vector<8x32xf32>
    %c0_76 = arith.constant 0 : index
    %c0_77 = arith.constant 0 : index
    %c0_78 = arith.constant 0 : index
    %186 = vector.load %arg16[%c0_76, %c0_77, %c0_78] : memref<1x1x32xf32, #tpu.memory_space<vmem>>, vector<1x1x32xf32>
    %187 = vector.shape_cast %186 : vector<1x1x32xf32> to vector<1x32xf32>
    %188 = vector.broadcast %187 : vector<1x32xf32> to vector<8x32xf32>
    %189 = arith.addf %185, %188 : vector<8x32xf32>
    %190 = arith.addf %134, %189 : vector<8x32xf32>
    %c0_79 = arith.constant 0 : index
    %c0_80 = arith.constant 0 : index
    %191 = vector.load %arg20[%c0_79, %c0_80] : memref<8x32xf32, #tpu.memory_space<vmem>>, vector<8x32xf32>
    tpu.vector_store %arg20[%c0_79, %c0_80], %190 {strides = array<i32>} : memref<8x32xf32, #tpu.memory_space<vmem>>, vector<8x32xf32>,
    %c1_i32 = arith.constant 1 : i32
    %192 = arith.cmpi eq, %arg1, %c1_i32 : i32
    %193 = arith.extui %192 : i1 to i32
    %c0_i32_81 = arith.constant 0 : i32
    %194 = arith.cmpi ne, %193, %c0_i32_81 : i32
    scf.if %194 {
      %195 = arith.truncf %190 : vector<8x32xf32> to vector<8x32xbf16>
      %c0_82 = arith.constant 0 : index
      %c0_83 = arith.constant 0 : index
      %196 = vector.load %arg17[%c0_82, %c0_83] : memref<32x16xbf16, #tpu.memory_space<vmem>>, vector<32x16xbf16>
      %cst_84 = arith.constant dense<0.000000e+00> : vector<8x16xf32>
      %197 = tpu.matmul %195, %196, %cst_84 {dimension_numbers = #tpu.dot_dimension_numbers<[1], [0], [0], [1], [0, 0, 1, 1], [], []>} : vector<8x32xbf16>, vector<32x16xbf16>, vector<8x16xf32> -> vector<8x16xf32>
      %c0_85 = arith.constant 0 : index
      %c0_86 = arith.constant 0 : index
      %198 = vector.load %arg18[%c0_85, %c0_86] : memref<1x16xf32, #tpu.memory_space<vmem>>, vector<1x16xf32>
      %199 = vector.broadcast %198 : vector<1x16xf32> to vector<8x16xf32>
      %200 = arith.addf %197, %199 : vector<8x16xf32>
      %c0_87 = arith.constant 0 : index
      %c0_88 = arith.constant 0 : index
      %c0_89 = arith.constant 0 : index
      %201 = vector.load %arg19[%c0_87, %c0_88, %c0_89] : memref<1x8x16xf32, #tpu.memory_space<vmem>>, vector<1x8x16xf32>
      %202 = vector.shape_cast %201 : vector<1x8x16xf32> to vector<8x16xf32>
      %203 = vector.shape_cast %200 : vector<8x16xf32> to vector<1x8x16xf32>
      tpu.vector_store %arg19[%c0_87, %c0_88, %c0_89], %203 {strides = array<i32>} : memref<1x8x16xf32, #tpu.memory_space<vmem>>, vector<1x8x16xf32>,
    } else {
    }
    return
  }
  func.func @transform_0(%arg0: i32, %arg1: i32) -> (i32, i32, i32) {
    %c0_i32 = arith.constant 0 : i32
    %c0_i32_0 = arith.constant 0 : i32
    %c0_i32_1 = arith.constant 0 : i32
    return %arg0, %c0_i32, %c0_i32_0 : i32, i32, i32
  }
  func.func @transform_1(%arg0: i32, %arg1: i32) -> (i32, i32, i32) {
    %c0_i32 = arith.constant 0 : i32
    %c0_i32_0 = arith.constant 0 : i32
    %c0_i32_1 = arith.constant 0 : i32
    %c0_i32_2 = arith.constant 0 : i32
    return %c0_i32, %c0_i32_0, %c0_i32_1 : i32, i32, i32
  }
  func.func @transform_2(%arg0: i32, %arg1: i32) -> (i32, i32, i32) {
    %c0_i32 = arith.constant 0 : i32
    %c0_i32_0 = arith.constant 0 : i32
    %c0_i32_1 = arith.constant 0 : i32
    return %arg0, %c0_i32, %c0_i32_0 : i32, i32, i32
  }
  func.func @transform_3(%arg0: i32, %arg1: i32) -> (i32, i32, i32) {
    %c0_i32 = arith.constant 0 : i32
    %c0_i32_0 = arith.constant 0 : i32
    %c0_i32_1 = arith.constant 0 : i32
    return %arg0, %c0_i32, %c0_i32_0 : i32, i32, i32
  }
  func.func @transform_4(%arg0: i32, %arg1: i32) -> (i32, i32, i32) {
    %c0_i32 = arith.constant 0 : i32
    %c0_i32_0 = arith.constant 0 : i32
    %c0_i32_1 = arith.constant 0 : i32
    return %arg1, %c0_i32, %c0_i32_0 : i32, i32, i32
  }
  func.func @transform_5(%arg0: i32, %arg1: i32) -> (i32, i32, i32) {
    %c0_i32 = arith.constant 0 : i32
    %c0_i32_0 = arith.constant 0 : i32
    %c0_i32_1 = arith.constant 0 : i32
    return %arg1, %c0_i32, %c0_i32_0 : i32, i32, i32
  }
  func.func @transform_6(%arg0: i32, %arg1: i32) -> (i32, i32, i32) {
    %c0_i32 = arith.constant 0 : i32
    %c0_i32_0 = arith.constant 0 : i32
    %c0_i32_1 = arith.constant 0 : i32
    return %arg1, %c0_i32, %c0_i32_0 : i32, i32, i32
  }
  func.func @transform_7(%arg0: i32, %arg1: i32) -> (i32, i32, i32) {
    %c0_i32 = arith.constant 0 : i32
    %c0_i32_0 = arith.constant 0 : i32
    %c0_i32_1 = arith.constant 0 : i32
    return %arg1, %c0_i32, %c0_i32_0 : i32, i32, i32
  }
  func.func @transform_8(%arg0: i32, %arg1: i32) -> (i32, i32, i32) {
    %c0_i32 = arith.constant 0 : i32
    %c0_i32_0 = arith.constant 0 : i32
    %c0_i32_1 = arith.constant 0 : i32
    return %arg1, %c0_i32, %c0_i32_0 : i32, i32, i32
  }
  func.func @transform_9(%arg0: i32, %arg1: i32) -> (i32, i32, i32) {
    %c0_i32 = arith.constant 0 : i32
    %c0_i32_0 = arith.constant 0 : i32
    %c0_i32_1 = arith.constant 0 : i32
    return %arg1, %c0_i32, %c0_i32_0 : i32, i32, i32
  }
  func.func @transform_10(%arg0: i32, %arg1: i32) -> (i32, i32, i32) {
    %c0_i32 = arith.constant 0 : i32
    %c0_i32_0 = arith.constant 0 : i32
    %c0_i32_1 = arith.constant 0 : i32
    return %arg1, %c0_i32, %c0_i32_0 : i32, i32, i32
  }
  func.func @transform_11(%arg0: i32, %arg1: i32) -> (i32, i32, i32) {
    %c0_i32 = arith.constant 0 : i32
    %c0_i32_0 = arith.constant 0 : i32
    %c0_i32_1 = arith.constant 0 : i32
    return %arg1, %c0_i32, %c0_i32_0 : i32, i32, i32
  }
  func.func @transform_12(%arg0: i32, %arg1: i32) -> (i32, i32, i32) {
    %c0_i32 = arith.constant 0 : i32
    %c0_i32_0 = arith.constant 0 : i32
    %c0_i32_1 = arith.constant 0 : i32
    return %arg1, %c0_i32, %c0_i32_0 : i32, i32, i32
  }
  func.func @transform_13(%arg0: i32, %arg1: i32) -> (i32, i32, i32) {
    %c0_i32 = arith.constant 0 : i32
    %c0_i32_0 = arith.constant 0 : i32
    %c0_i32_1 = arith.constant 0 : i32
    return %arg1, %c0_i32, %c0_i32_0 : i32, i32, i32
  }
  func.func @transform_14(%arg0: i32, %arg1: i32) -> (i32, i32, i32) {
    %c0_i32 = arith.constant 0 : i32
    %c0_i32_0 = arith.constant 0 : i32
    %c0_i32_1 = arith.constant 0 : i32
    return %arg1, %c0_i32, %c0_i32_0 : i32, i32, i32
  }
  func.func @transform_15(%arg0: i32, %arg1: i32) -> (i32, i32) {
    %c0_i32 = arith.constant 0 : i32
    %c0_i32_0 = arith.constant 0 : i32
    %c0_i32_1 = arith.constant 0 : i32
    return %c0_i32, %c0_i32_0 : i32, i32
  }
  func.func @transform_16(%arg0: i32, %arg1: i32) -> (i32, i32) {
    %c0_i32 = arith.constant 0 : i32
    %c0_i32_0 = arith.constant 0 : i32
    %c0_i32_1 = arith.constant 0 : i32
    return %c0_i32, %c0_i32_0 : i32, i32
  }
  func.func @transform_17(%arg0: i32, %arg1: i32) -> (i32, i32, i32) {
    %c0_i32 = arith.constant 0 : i32
    %c0_i32_0 = arith.constant 0 : i32
    %c0_i32_1 = arith.constant 0 : i32
    return %arg0, %c0_i32, %c0_i32_0 : i32, i32, i32
  }
}

</mosaic_0001>

<bundles_post_ra>
// kernel: _lambda_.4
= control target key start
LH: loop header
LB: loop body
LE: loop exit
PB: predicated region body
PF: predicated region fallthrough
CT: control target
= control target key end

     0   :  { %vm50_vm0 = vcmask 1040384   ;;  %v294_v1 = vmov 0   ;;  %vm46_vm1 = vcmask 7168   ;;  %vm83_vm2 = vcmask 130048   ;;  %s408_s1 = inlined_call_operand.vmem [shape: bf16[1,16], index: 1, kind: input, shape index: {}]   ;;  %s409_s0 = inlined_call_operand.vmem [shape: f32[4,1], index: 0, kind: input, shape index: {}]   ;;  %s410_s2 = inlined_call_operand.vmem [shape: f32[1,16], index: 2, kind: input, shape index: {}]   ;;  %s411_s4 = inlined_call_operand.vmem [shape: f32[1,32], index: 4, kind: input, shape index: {}]   ;;  %s412_s3 = inlined_call_operand.vmem [shape: bf16[16,32], index: 3, kind: input, shape index: {}]   ;;  %s413_s6 = inlined_call_operand.vmem [shape: f32[1,64], index: 6, kind: input, shape index: {}]   ;;  %s414_s5 = inlined_call_operand.vmem [shape: bf16[32,64], index: 5, kind: input, shape index: {}]   ;;  %s415_s7 = inlined_call_operand.vmem [shape: bf16[64,32], index: 7, kind: input, shape index: {}]   ;;  %s416_s8 = inlined_call_operand.vmem [shape: f32[1,32], index: 8, kind: input, shape index: {}]   ;;  %s417_s9 = inlined_call_operand.vmem [shape: bf16[32,32], index: 9, kind: input, shape index: {}]   ;;  %s418_s10 = inlined_call_operand.vmem [shape: f32[1,32], index: 10, kind: input, shape index: {}]   ;;  %s419_s11 = inlined_call_operand.vmem [shape: f32[4,32], index: 11, kind: output, shape index: {}]  }
   0x1   :  { %v41_v0 = vld [vmem:[%s408_s1] sm:$0x1]  ;;  %v52_v2 = vsel %vm50_vm0, 65535, %v294_v1  ;;  %v281_v13 = vld [vmem:[%s414_s5 + $0x8] sm:$0xff]  ;;  %v285_v15 = vld [vmem:[%s415_s7 + $0x18] sm:$0xff]  ;;  %vm122_vm3 = vcmask 261120  }
   0x2   :  { %v39_v3 = vld [vmem:[%s409_s0] sm:$0xf]  ;;  %v54_v4 = vand.u32 %v52_v2, %v41_v0  ;;  %132 = vmatpush.bf16.msra.mxu2 %v281_v13  ;;  %185 = vmatpush.bf16.msra.mxu3 %v285_v15  ;;  %v284_v16 = vld [vmem:[%s415_s7 + $0x10] sm:$0xff]  ;;  %v283_v23 = vld [vmem:[%s415_s7 + $0x8] sm:$0xff]  ;;  %vm177_vm4 = vcmask 523264   ;;  %vm232_vm5 = vcmask 257024  }
   0x3   :  { %v40_v5 = vpack.c.bf16 %v39_v3, %v39_v3  ;;  %v279_v6 = vld [vmem:[%s412_s3] sm:$0xff]  ;;  %v287_v25 = vld [vmem:[%s417_s9 + $0x8] sm:$0xff] }
   0x4   :  { %63 = vmatpush.bf16.msra.mxu0 %v54_v4  ;;  %94 = vmatpush.bf16.msra.mxu1 %v279_v6  ;;  %v289_v7 = vld [vmem:[%s410_s2] ss:$0 sm:$0xff] }
   0x5   :  { %v280_v14 = vld [vmem:[%s414_s5] sm:$0xff] }
   0x6   :  { %133 = vmatpush.bf16.msra.mxu2 %v280_v14  ;;  %186 = vmatpush.bf16.msra.mxu3 %v284_v16  ;;  %v290_v17 = vld [vmem:[%s411_s4] ss:$0 sm:$0xff] }
   0x7   :  { %238 = vmatmul.msk.bf16.vlgmr.msra.gmra.mxu0 %vm46_vm1, %v40_v5  ;;  %v282_v24 = vld [vmem:[%s415_s7] sm:$0xff] }
   0x8   :  { %225 = vmatpush.bf16.msrb.mxu0 %v287_v25  ;;  %v286_v26 = vld [vmem:[%s417_s9] sm:$0xff] }
   0x9   :  { %v291_v27 = vld [vmem:[%s413_s6] ss:$0 sm:$0xff] }
   0xa   :  { %187 = vmatpush.bf16.msra.mxu3 %v283_v23  ;;  %v292_v33 = vld [vmem:[%s416_s8] ss:$0 sm:$0xff] }
   0xb   :  { %v293_v39 = vld [vmem:[%s418_s10] ss:$0 sm:$0xff] }
   0xc   :  { %226 = vmatpush.bf16.msrb.mxu0 %v286_v26 }
   0xe   :  { %188 = vmatpush.bf16.msra.mxu3 %v282_v24 }
  0x84   :  { %v65_v8 = vpop.f32.mrf.mxu0 }
  0x85   :  { %v66_v9 = vadd.f32 %v289_v7, %v65_v8 }
  0x87   :  { %v69_v10 = vmax.f32 %v66_v9, 0.0 }
  0x89   :  { %v70_v11 = vpack.c.bf16 %v69_v10, %v69_v10 }
  0x8b   :  { %243 = vmatmul.msk.bf16.vlgmr.msra.gmra.mxu1 %vm83_vm2, %v70_v11 }
  0x8c   :  { %v67_v12 = vpop.f32.mrf.mxu0 }
 0x108   :  { %v96_v18 = vpop.f32.mrf.mxu1 }
 0x109   :  { %v97_v19 = vadd.f32 %v290_v17, %v96_v18 }
 0x10b   :  { %v100_v20 = vmax.f32 %v97_v19, 0.0 }
 0x10d   :  { %v101_v21 = vpack.c.bf16 %v100_v20, %v100_v20 }
 0x10f   :  { %252 = vmatmul.msk.bf16.vlgmr.msra.gmra.mxu2 %vm122_vm3, %v101_v21 }
 0x110   :  { %v98_v22 = vpop.f32.mrf.mxu1 }
 0x192   :  { %v135_v28 = vpop.f32.mrf.mxu2 }
 0x193   :  { %v136_v29 = vadd.f32 %v291_v27, %v135_v28 }
 0x195   :  { %v139_v30 = vmax.f32 %v136_v29, 0.0 }
 0x197   :  { %v140_v31 = vpack.c.bf16 %v139_v30, %v139_v30 }
 0x199   :  { %269 = vmatmul.msk.bf16.vlgmr.msra.gmra.mxu3 %vm177_vm4, %v140_v31 }
 0x19a   :  { %v137_v32 = vpop.f32.mrf.mxu2 }
 0x21c   :  { %v190_v34 = vpop.f32.mrf.mxu3 }
 0x21d   :  { %v191_v35 = vadd.f32 %v292_v33, %v190_v34 }
 0x21f   :  { %v194_v36 = vmax.f32 %v191_v35, 0.0 }
 0x221   :  { %v195_v37 = vpack.c.bf16 %v194_v36, %v194_v36 }
 0x223   :  { %278 = vmatmul.msk.bf16.vlgmr.msrb.gmra.mxu0 %vm122_vm3, %v195_v37 }
 0x224   :  { %v192_v38 = vpop.f32.mrf.mxu3 }
 0x2a0   :  { %v228_v40 = vpop.f32.mrf.mxu0 }
 0x2a1   :  { %v229_v41 = vadd.f32 %v293_v39, %v228_v40 }
 0x2a3   :  { %233 = vst.msk [vmem:[%s419_s11] sm:$0xf] %vm232_vm5, %v229_v41 }
 0x2a8   :  { %v230_v42 = vpop.f32.mrf.mxu0 }

// kernel: _lambda_.5
= control target key start
LH: loop header
LB: loop body
LE: loop exit
PB: predicated region body
PF: predicated region fallthrough
CT: control target
= control target key end

     0   :  { %s1913_s24 = smov 0   ;;  %s1915_s25 = smov 0   ;;  %s2155_s0 = inlined_call_operand.vmem [shape: f32[2,8,32], index: 0, kind: input, shape index: {}]   ;;  %s2156_s1 = inlined_call_operand.vmem [shape: f32[1,4,32], index: 1, kind: input, shape index: {}]   ;;  %s2157_s2 = inlined_call_operand.vmem [shape: f32[2,2,32], index: 2, kind: input, shape index: {}]   ;;  %s2158_s3 = inlined_call_operand.vmem [shape: f32[2,2,32], index: 3, kind: input, shape index: {}]   ;;  %s2159_s4 = inlined_call_operand.vmem [shape: f32[2,1,32], index: 4, kind: input, shape index: {}]   ;;  %s2160_s5 = inlined_call_operand.vmem [shape: f32[2,1,32], index: 5, kind: input, shape index: {}]   ;;  %s2161_s6 = inlined_call_operand.vmem [shape: bf16[2,32,96], index: 6, kind: input, shape index: {}]   ;;  %s2162_s7 = inlined_call_operand.vmem [shape: bf16[2,32,32], index: 7, kind: input, shape index: {}]   ;;  %s2163_s8 = inlined_call_operand.vmem [shape: f32[2,1,32], index: 8, kind: input, shape index: {}]   ;;  %s2164_s9 = inlined_call_operand.vmem [shape: f32[2,1,32], index: 9, kind: input, shape index: {}]   ;;  %s2165_s10 = inlined_call_operand.vmem [shape: f32[2,1,32], index: 10, kind: input, shape index: {}]   ;;  %s2166_s11 = inlined_call_operand.vmem [shape: bf16[2,32,128], index: 11, kind: input, shape index: {}]   ;;  %s2167_s12 = inlined_call_operand.vmem [shape: f32[2,1,128], index: 12, kind: input, shape index: {}]   ;;  %s2168_s13 = inlined_call_operand.vmem [shape: bf16[2,128,32], index: 13, kind: input, shape index: {}]   ;;  %s2169_s14 = inlined_call_operand.vmem [shape: f32[2,1,32], index: 14, kind: input, shape index: {}]   ;;  %s2170_s15 = inlined_call_operand.vmem [shape: bf16[32,16], index: 15, kind: input, shape index: {}]   ;;  %s2171_s16 = inlined_call_operand.vmem [shape: f32[1,16], index: 16, kind: input, shape index: {}]   ;;  %s2172_s17 = inlined_call_operand.vmem [shape: f32[2,8,16], index: 17, kind: output, shape index: {}]  }
   0x1   :  { %2178 = sst [smem:[#allocation10_spill]] %s2155_s0  ;;  %s1917_s26 = smov 0  }
   0x2   :  { %2179 = sst [smem:[#allocation11_spill]] %s2156_s1  ;;  %s1919_s27 = smov 0  }
   0x3   :  { %2180 = sst [smem:[#allocation12_spill]] %s2157_s2  ;;  %s1921_s28 = smov 0  }
   0x4   :  { %2181 = sst [smem:[#allocation13_spill]] %s2158_s3 }
   0x5   :  { %2182 = sst [smem:[#allocation14_spill]] %s2161_s6 }
   0x6   :  { %2183 = sst [smem:[#allocation15_spill]] %s2162_s7 }
   0x7   :  { %2184 = sst [smem:[#allocation16_spill]] %s2163_s8 }
   0x8   :  { %2185 = sst [smem:[#allocation17_spill]] %s2165_s10 }
   0x9   :  { %2186 = sst [smem:[#allocation18_spill]] %s2168_s13 }
   0xa   :  { %2187 = sst [smem:[#allocation19_spill]] %s2169_s14 }
   0xb   :  { %2188 = sst [smem:[#allocation20_spill]] %s2170_s15 }
   0xc   :  { %2189 = sst [smem:[#allocation21_spill]] %s2171_s16 }
   0xd   :  { %2190 = sst [smem:[#allocation22_spill]] %s2172_s17 }
   0xe LB: > { %2191 = sst [smem:[#allocation4_spill]] %s1790_s24  ;;  %s36_s29 = sadd.s32 1, %s1798_s26  ;;  %s1806_s28 = sphi %s1921_s28, %s27_s28   ;;  %s1802_s27 = sphi %s1919_s27, %s2224_s27   ;;  %s1798_s26 = sphi %s1917_s26, %s2223_s26   ;;  %s1794_s25 = sphi %s1915_s25, %s2222_s25   ;;  %s1790_s24 = sphi %s1913_s24, %s2221_s24  }
   0xf   : > { %2192 = sst [smem:[#allocation5_spill]] %s1798_s26  ;;  %s39_s0 = sadd.s32 1, %s1802_s27 }
  0x10   : > { %2193 = sst [smem:[#allocation6_spill]] %s1802_s27  ;;  %p37_p0 = scmp.ge.s32.totalorder %s36_s29, 2 }
  0x11   : > { %2194 = sst [smem:[#allocation7_spill]] %s1806_s28  ;;  %p1568_p1 = scmp.ge.s32.totalorder %s1806_s28, 1 }
  0x12   : > { %p612_p2 = scmp.lt.s32.totalorder %s1806_s28, 5  ;;  %s2226_s29 = smov (%p37_p0, %s36_s29), 0 }
  0x13   : > { %2195 = sst [smem:[#allocation8_spill]] %s2226_s29  ;;  %s2228_s0 = smov (!%p37_p0, %s39_s0), %s1802_s27 }
  0x14   : > { %p613_p3 = pnand %p1568_p1, %p612_p2  ;;  %p41_p4 = scmp.ge.s32.totalorder %s2228_s0, 2 }
  0x15   : > { %p711_p5 = scmp.lt.s32.totalorder (!%p613_p3), %s1794_s25, 1  ;;  %p723_p6 = scmp.lt.s32.totalorder (!%p613_p3), %s1790_s24, 1 }
  0x16   : > { %s2230_s0 = smov (%p41_p4, %s2228_s0), 0  ;;  %616 = sbr.rel (%p613_p3) target bundleno = 2516 (0x9d4), region = 88 }
  0x17   : > { %2196 = sst [smem:[#allocation9_spill]] %s2230_s0 }
  0x18   : > { %s2197_s21 = sld [smem:[#allocation10_spill]] (!%p613_p3) }
  0x19   : > { %s2198_s2 = sld [smem:[#allocation12_spill]] (!%p613_p3) }
  0x1a   : > { %s2199_s3 = sld [smem:[#allocation13_spill]] (!%p613_p3) }
  0x1b   : > { %s2232_s25 = smov (!%p711_p5, %s1794_s25), 1  ;;  %s2200_s6 = sld [smem:[#allocation14_spill]] }
  0x1c   : > { %s1947_s30 = scalar_select %p723_p6, %s1790_s24, 1 }
  0x1d   : > { %s1569_s18 = sshll.u32 %s2232_s25, 3  ;;  %s1570_s19 = sshll.u32 %s2232_s25, 1 }
  0x1e   : > { %s714_s22 = scalar_lea.vmem %s2197_s21, %s1569_s18  ;;  %s1661_s13 = sshll.u32 %s1947_s30, 4 }
  0x1f   : > { %s718_s29 = scalar_lea.vmem %s2198_s2, %s1570_s19  ;;  %s2201_s7 = sld [smem:[#allocation15_spill]] }
  0x20   : > { %s722_s28 = scalar_lea.vmem %s2199_s3, %s1570_s19  ;;  %s1992_s3 = scalar_lea.vmem %s2166_s11, %s1661_s13 }
  0x21   : > { %s1970_s21 = scalar_lea.vmem %s2200_s6, %s1661_s13  ;;  %s755_s6 = scalar_lea.vmem %s2167_s12, %s1947_s30 }
  0x22   : > { %s2204_s15 = sld [smem:[#allocation18_spill]] }
  0x23   : > { %s2205_s14 = sld [smem:[#allocation19_spill]] }
  0x24   : > { %s2206_s10 = sld [smem:[#allocation22_spill]] }
  0x25   : > { %s1975_s2 = scalar_lea.vmem %s2201_s7, %s1661_s13  ;;  %s1664_s7 = sshll.u32 %s1947_s30, 6 }
  0x26   : > { %s2207_s13 = sld [smem:[#allocation4_spill]] }
  0x28   : > { %s2002_s8 = scalar_lea.vmem %s2204_s15, %s1664_s7 }
  0x29   : > { %s763_s25 = scalar_lea.vmem %s2205_s14, %s1947_s30 }
  0x2a   : > { %s2011_s1 = scalar_lea.vmem %s2206_s10, %s1569_s18 }
  0x2c   : > { %p1581_p7 = scmp.ne.s32.totalorder %s2207_s13, 0 }
  0x2d   : > { %s2208_s23 = sld [smem:[#allocation11_spill]] (!%p1581_p7) }
  0x2e   : > { %772 = sbr.rel (%p1581_p7) target bundleno = 62 (0x3e), region = 92 }
  0x33   : > { %v773_v0 = vld [vmem:[%s714_s22] sm:$0xff]  ;;  %vm782_vm0 = vcmask 257024   ;;  %vm792_vm1 = vcmask 261124  }
  0x34   : > { %v774_v1 = vld [vmem:[%s2208_s23] sm:$0xf] }
  0x35   : > { %v775_v2 = vld [vmem:[%s718_s29] sm:$0x3]  ;;  %v777_v4 = vadd.f32 %v774_v1, %v773_v0  ;;  %v785_v6 = vrot.slane %v774_v1, 4 }
  0x36   : > { %v776_v3 = vld [vmem:[%s722_s28] sm:$0x3]  ;;  %v778_v5 = vperm.slane %v775_v2, 0  ;;  %v788_v7 = vperm.slane %v775_v2, 1 }
  0x37   : > { %v780_v8 = vperm.slane %v776_v3, 0  ;;  %v787_v10 = vadd.f32 %v785_v6, %v773_v0  ;;  %v790_v11 = vperm.slane %v776_v3, 1 }
  0x38   : > { %v779_v9 = vadd.f32 %v778_v5, %v777_v4 }
  0x39   : > { %v789_v13 = vadd.f32 %v788_v7, %v787_v10 }
  0x3a   : > { %v781_v12 = vadd.f32 %v780_v8, %v779_v9 }
  0x3b   : > { %v791_v14 = vadd.f32 %v790_v11, %v789_v13 }
  0x3c   : > { %783 = vst.msk [vmem:[#allocation2] sm:$0xf] %vm782_vm0, %v781_v12 }
  0x3d   : > { %793 = vst.msk [vmem:[#allocation2] sm:$0xf0] %vm792_vm1, %v791_v14 }
  0x3e PF: > { %vm797_vm2 = vcmask 261120   ;;  %v1808_v17 = vmov 32.0   ;;  %v1666_v29 = vld [vmem:[%s1970_s21 + $0x8] sm:$0xff]  ;;  %v1665_v30 = vld [vmem:[%s1970_s21] sm:$0xff]  ;;  %s2209_s24 = scalar_lea.vmem %s2159_s4, %s1947_s30  ;;  %s2210_s18 = scalar_lea.vmem %s2160_s5, %s1947_s30  ;;  %vm910_vm7 = vcmask 1043456   ;;  %vm872_vm8 = vcmask 64512  }
  0x3f   : > { %1743 = vrcp.f32 %v1808_v17  ;;  %861 = vmatpush.bf16.msra.mxu0 %v1666_v29  ;;  %v1736_v40 = vld [vmem:[%s2209_s24] ss:$0 sm:$0xff]  ;;  %s1809_s22 = smov 88   ;;  %s1810_s21 = smov 64   ;;  %vm928_vm9 = vcmask 60416   ;;  %vm992_vm10 = vcmask 126016  }
  0x40   : > { %v1737_v43 = vld [vmem:[%s2210_s18] ss:$0 sm:$0xff]  ;;  %s1811_s15 = smov 96   ;;  %s1812_s14 = smov 72   ;;  %vm1056_vm11 = vcmask 191616   ;;  %vm1120_vm12 = vcmask 257216  }
  0x41   : > { %s1813_s26 = smov 80   ;;  %s1814_s27 = smov 120  }
  0x42   : > { %s1815_s16 = smov 104   ;;  %s1816_s19 = smov 112  }
  0x43   : > { %862 = vmatpush.bf16.msra.mxu0 %v1665_v30  ;;  %s1817_s17 = smov 40   ;;  %s1818_s13 = smov 48  }
  0x44   : > { %v2017_v15 = vld [vmem:[#allocation2] sm:$0xff]  ;;  %s1819_s20 = smov 56   ;;  %s1820_s0 = smov 16  }
  0x45   : > { %v798_v16 = vsel %vm797_vm2, %v2017_v15, 0.0  ;;  %v1744_v18 = vpop.eup %1743  ;;  %s1821_s23 = smov 8   ;;  %s1822_s7 = smov 24  }
  0x46   : > { %799 = vadd.xlane.f32.xlu0 %v798_v16  ;;  %v802_v19 = vmul.f32 32.0, %v1744_v18  ;;  %vm806_vm3 = vweird.f32 %v1744_v18  ;;  %s2211_s28 = sld [smem:[#allocation16_spill]]  ;;  %s2213_s18 = scalar_lea.vmem %s2164_s9, %s1947_s30 }
  0x48   : > { %v803_v20 = vsub.f32 1.0, %v802_v19 }
  0x4a   : > { %v804_v21 = vmul.f32 %v1744_v18, %v803_v20 }
  0x4c   : > { %v805_v22 = vadd.f32 %v1744_v18, %v804_v21  ;;  %s2212_s29 = scalar_lea.vmem %s2211_s28, %s1947_s30 }
  0x4e   : > { %v2021_v23 = vsel %vm806_vm3, %v1744_v18, %v805_v22 }
  0xb9   : > { %v800_v24 = vpop.xlane.xlu0 %799 }
  0xba   : > { %v808_v25 = vmul.f32 %v2021_v23, %v800_v24 }
  0xbc   : > { %v809_v26 = vsub.f32 %v2017_v15, %v808_v25 }
  0xbe   : > { %v810_v27 = vmul.f32 %v809_v26, %v809_v26 }
  0xc0   : > { %v811_v28 = vsel %vm797_vm2, %v810_v27, 0.0 }
  0xc1   : > { %812 = vadd.xlane.f32.xlu0 %v811_v28 }
 0x134   : > { %v813_v31 = vpop.xlane.xlu0 %812 }
 0x135   : > { %v814_v32 = vmul.f32 %v813_v31, %v2021_v23 }
 0x137   : > { %v815_v33 = vadd.f32 1e-05, %v814_v32 }
 0x139   : > { %1745 = vrsqrt.f32 %v815_v33  ;;  %vm822_vm5 = vweird.f32 %v815_v33 }
 0x13f   : > { %v1746_v34 = vpop.eup %1745 }
 0x140   : > { %v817_v35 = vmul.f32 %v1746_v34, %v815_v33  ;;  %vm823_vm4 = vweird.f32 %v1746_v34 }
 0x141   : > { %vm824_vm6 = vmor %vm822_vm5, %vm823_vm4 }
 0x142   : > { %v818_v36 = vmul.f32 %v1746_v34, %v817_v35 }
 0x144   : > { %v819_v37 = vmul.f32 0.5, %v818_v36 }
 0x146   : > { %v820_v38 = vsub.f32 1.5, %v819_v37 }
 0x148   : > { %v821_v39 = vmul.f32 %v1746_v34, %v820_v38 }
 0x14a   : > { %v825_v41 = vsel %vm824_vm6, %v1746_v34, %v821_v39 }
 0x14b   : > { %v826_v42 = vmul.f32 %v825_v41, %v809_v26 }
 0x14d   : > { %v830_v44 = vmul.f32 %v1736_v40, %v826_v42 }
 0x14f   : > { %v834_v45 = vadd.f32 %v1737_v43, %v830_v44 }
 0x151   : > { %v835_v46 = vpack.c.bf16 %v834_v45, %v834_v45 }
 0x153   : > { %1590 = vmatmul.msk.bf16.vlgmr.msra.gmra.mxu0 %vm797_vm2, %v835_v46 }
 0x1d0   : > { %v864_v47 = vpop.f32.mrf.mxu0 }
 0x1d1   : > { %v2040_v48 = vpack.c.bf16 %v864_v47, %v864_v47 }
 0x1d3   : > { %932 = vrot.lane.b32.xlu0 %v2040_v48, %s1809_s22  ;;  %905 = vrot.lane.b32.xlu2 %v2040_v48, %s1810_s21 }
 0x1d4   : > { %870 = vrot.lane.b32.xlu1 %v2040_v48, %s1811_s15  ;;  %s2214_s15 = sld [smem:[#allocation17_spill]] }
 0x1d8   : > { %v866_v49 = vpop.f32.mrf.mxu0 }
 0x1db   : > { %1060 = vrot.lane.b32.xlu0 %v2040_v48, %s1812_s14  ;;  %s2215_s14 = scalar_lea.vmem %s2214_s15, %s1947_s30 }
 0x1e3   : > { %996 = vrot.lane.b32.xlu0 %v2040_v48, %s1813_s26 }
 0x22d   : > { %v906_v50 = vpop.permute.xlu2 %905 }
 0x22e   : > { %v912_v51 = vsel %vm910_vm7, %v906_v50, 0 }
 0x22f   : > { %921 = vmatpush.bf16.msra.mxu2 %v912_v51 }
 0x245   : > { %v933_v52 = vpop.permute.xlu0 %932 }
 0x246   : > { %v871_v53 = vpop.permute.xlu1 %870  ;;  %v938_v54 = vsel %vm872_vm8, %v933_v52, 0 }
 0x247   : > { %v877_v55 = vsel %vm872_vm8, %v871_v53, 0  ;;  %947 = vmatpush.bf16.xpose.msrb.mxu2 %v938_v54 }
 0x248   : > { %886 = vmatpush.bf16.xpose.msra.mxu1 %v877_v55 }
 0x24d   : > { %v1061_v56 = vpop.permute.xlu0 %1060 }
 0x24e   : > { %v1066_v57 = vsel %vm872_vm8, %v1061_v56, 0 }
 0x24f   : > { %1591 = vmatmul.msk.bf16.vlgmr.msra.gmra.mxu1 %vm872_vm8, %v2040_v48  ;;  %1075 = vmatpush.bf16.xpose.msra.mxu3 %v1066_v57 }
 0x255   : > { %v997_v58 = vpop.permute.xlu0 %996 }
 0x256   : > { %v1002_v59 = vsel %vm872_vm8, %v997_v58, 0 }
 0x257   : > { %1011 = vmatpush.bf16.xpose.msrb.mxu0 %v1002_v59 }
 0x2cc   : > { %v888_v60 = vpop.f32.mrf.mxu1 }
 0x2cd   : > { %v892_v61 = vmul.f32 0.35355338, %v888_v60 }
 0x2cf   : > { %v893_v62 = vsel %vm872_vm8, %v892_v61, -inf }
 0x2d0   : > { %894 = vmax.xlane.f32.xlu1 %v893_v62 }
 0x2d4   : > { %v890_v63 = vpop.f32.mrf.mxu1 }
 0x343   : > { %v895_v0 = vpop.xlane.xlu1 %894 }
 0x344   : > { %v896_v1 = vsub.f32 %v892_v61, %v895_v0 }
 0x346   : > { %v897_v2 = vmul.f32 1.442695, %v896_v1 }
 0x348   : > { %1747 = vpow2.f32 %v897_v2 }
 0x34e   : > { %v1748_v3 = vpop.eup %1747 }
 0x34f   : > { %v899_v4 = vsel %vm872_vm8, %v1748_v3, 0.0 }
 0x350   : > { %900 = vadd.xlane.f32.xlu2 %v899_v4 }
 0x368   : > { %930 = vrot.lane.b32.xlu2 %v2040_v48, %s1814_s27 }
 0x370   : > { %1058 = vrot.lane.b32.xlu2 %v2040_v48, %s1815_s16 }
 0x378   : > { %994 = vrot.lane.b32.xlu2 %v2040_v48, %s1816_s19 }
 0x3c3   : > { %v901_v5 = vpop.xlane.xlu2 %900 }
 0x3c4   : > { %1749 = vrcp.f32 %v901_v5 }
 0x3ca   : > { %v1750_v6 = vpop.eup %1749 }
 0x3cb   : > { %v931_v7 = vpop.permute.xlu2 %930  ;;  %v903_v8 = vmul.f32 %v1750_v6, %v1748_v3 }
 0x3cd   : > { %v904_v9 = vpack.c.bf16 %v903_v8, %v903_v8 }
 0x3cf   : > { %1592 = vmatmul.msk.bf16.vlgmr.msra.gmra.mxu2 %vm872_vm8, %v904_v9 }
 0x3d3   : > { %v1059_v10 = vpop.permute.xlu2 %1058 }
 0x3d4   : > { %1597 = vmatmul.msk.bf16.vlgmr.msra.gmra.mxu3 %vm872_vm8, %v1059_v10  ;;  %v1667_v10 = vld [vmem:[%s1975_s2] sm:$0xff] }
 0x3db   : > { %v995_v11 = vpop.permute.xlu2 %994 }
 0x3dc   : > { %1595 = vmatmul.msk.bf16.vlgmr.msrb.gmra.mxu0 %vm872_vm8, %v995_v11 }
 0x3df   : > { %1593 = vmatmul.msk.bf16.vlgmr.msrb.gmra.mxu2 %vm872_vm8, %v931_v7  ;;  %v1668_v7 = vld [vmem:[%s1975_s2 + $0x8] sm:$0xff] }
 0x3e0   : > { %1152 = vmatpush.bf16.msra.mxu0 %v1668_v7 }
 0x3e4   : > { %1153 = vmatpush.bf16.msra.mxu0 %v1667_v10 }
 0x452   : > { %v923_v12 = vpop.f32.mrf.mxu2 }
 0x453   : > { %v927_v13 = vpack.c.bf16 %v923_v12, %v923_v12 }
 0x455   : > { %929 = vst.msk [vmem:[#allocation3] sm:$0xf] %vm928_vm9, %v927_v13  ;;  %v1738_v13 = vld [vmem:[%s2212_s29] ss:$0 sm:$0xff] }
 0x457   : > { %v1077_v14 = vpop.f32.mrf.mxu3 }
 0x458   : > { %v1081_v16 = vmul.f32 0.35355338, %v1077_v14 }
 0x459   : > { %v1013_v17 = vpop.f32.mrf.mxu0 }
 0x45a   : > { %v1017_v18 = vmul.f32 0.35355338, %v1013_v17  ;;  %v925_v19 = vpop.f32.mrf.mxu2  ;;  %v1082_v20 = vsel %vm872_vm8, %v1081_v16, -inf }
 0x45b   : > { %1083 = vmax.xlane.f32.xlu0 %v1082_v20 }
 0x45c   : > { %v1018_v21 = vsel %vm872_vm8, %v1017_v18, -inf }
 0x45d   : > { %1019 = vmax.xlane.f32.xlu2 %v1018_v21 }
 0x45f   : > { %v1079_v22 = vpop.f32.mrf.mxu3 }
 0x461   : > { %v1015_v24 = vpop.f32.mrf.mxu0 }
 0x462   : > { %v949_v25 = vpop.f32.mrf.mxu2 }
 0x463   : > { %v953_v26 = vmul.f32 0.35355338, %v949_v25 }
 0x465   : > { %v954_v27 = vsel %vm872_vm8, %v953_v26, -inf }
 0x466   : > { %955 = vmax.xlane.f32.xlu1 %v954_v27  ;;  %v1669_v27 = vld [vmem:[%s1992_s3] sm:$0xff] }
 0x46a   : > { %v951_v28 = vpop.f32.mrf.mxu2 }
 0x475   : > { %1094 = vrot.lane.b32.xlu2 %v2040_v48, %s1817_s17 }
 0x4ce   : > { %v1084_v39 = vpop.xlane.xlu0 %1083 }
 0x4cf   : > { %v1085_v40 = vsub.f32 %v1081_v16, %v1084_v39  ;;  %v1740_v39 = vld [vmem:[%s2215_s14] ss:$0 sm:$0xff] }
 0x4d0   : > { %v1020_v29 = vpop.xlane.xlu2 %1019 }
 0x4d1   : > { %v1021_v30 = vsub.f32 %v1017_v18, %v1020_v29  ;;  %v1086_v41 = vmul.f32 1.442695, %v1085_v40 }
 0x4d3   : > { %v1022_v31 = vmul.f32 1.442695, %v1021_v30 }
 0x4d5   : > { %1751 = vpow2.f32 %v1022_v31 }
 0x4d8   : > { %v1095_v52 = vpop.permute.xlu2 %1094 }
 0x4d9   : > { %v956_v32 = vpop.xlane.xlu1 %955  ;;  %v1100_v56 = vsel %vm910_vm7, %v1095_v52, 0 }
 0x4da   : > { %v957_v33 = vsub.f32 %v953_v26, %v956_v32  ;;  %v1670_v26 = vld [vmem:[%s1992_s3 + $0x8] sm:$0xff] }
 0x4db   : > { %v1752_v34 = vpop.eup %1751 }
 0x4dc   : > { %v958_v35 = vmul.f32 1.442695, %v957_v33  ;;  %v1024_v36 = vsel %vm872_vm8, %v1752_v34, 0.0 }
 0x4dd   : > { %1025 = vadd.xlane.f32.xlu0 %v1024_v36 }
 0x4de   : > { %1753 = vpow2.f32 %v958_v35 }
 0x4df   : > { %1755 = vpow2.f32 %v1086_v41 }
 0x4e4   : > { %v1754_v37 = vpop.eup %1753 }
 0x4e5   : > { %v960_v38 = vsel %vm872_vm8, %v1754_v37, 0.0  ;;  %v1756_v42 = vpop.eup %1755 }
 0x4e6   : > { %961 = vadd.xlane.f32.xlu1 %v960_v38  ;;  %v1088_v43 = vsel %vm872_vm8, %v1756_v42, 0.0 }
 0x4f1   : > { %1030 = vrot.lane.b32.xlu0 %v2040_v48, %s1818_s13 }
 0x4ff   : > { %966 = vrot.lane.b32.xlu1 %v2040_v48, %s1819_s20 }
 0x529   : > { %1089 = vadd.xlane.f32.xlu1 %v1088_v43  ;;  %v1677_v43 = vld [vmem:[%s2002_s8 + $0x30] sm:$0xff] }
 0x550   : > { %v1026_v44 = vpop.xlane.xlu0 %1025 }
 0x551   : > { %1757 = vrcp.f32 %v1026_v44  ;;  %v1676_v44 = vld [vmem:[%s2002_s8 + $0x28] sm:$0xff] }
 0x557   : > { %v1758_v45 = vpop.eup %1757 }
 0x558   : > { %v1028_v46 = vmul.f32 %v1758_v45, %v1752_v34  ;;  %v1675_v45 = vld [vmem:[%s2002_s8 + $0x20] sm:$0xff] }
 0x559   : > { %v962_v49 = vpop.xlane.xlu1 %961 }
 0x55a   : > { %v1029_v51 = vpack.c.bf16 %v1028_v46, %v1028_v46  ;;  %1759 = vrcp.f32 %v962_v49  ;;  %v1674_v46 = vld [vmem:[%s2002_s8 + $0x18] sm:$0xff]  ;;  %v1672_v49 = vld [vmem:[%s2002_s8 + $0x8] sm:$0xff] }
 0x560   : > { %v1760_v48 = vpop.eup %1759 }
 0x561   : > { %v964_v53 = vmul.f32 %v1760_v48, %v1754_v37 }
 0x563   : > { %v1031_v47 = vpop.permute.xlu0 %1030  ;;  %v965_v57 = vpack.c.bf16 %v964_v53, %v964_v53 }
 0x564   : > { %v1036_v50 = vsel %vm910_vm7, %v1031_v47, 0  ;;  %v1673_v47 = vld [vmem:[%s2002_s8 + $0x10] sm:$0xff] }
 0x565   : > { %1045 = vmatpush.bf16.msrb.mxu1 %v1036_v50  ;;  %v1671_v50 = vld [vmem:[%s2002_s8] sm:$0xff] }
 0x568   : > { %1596 = vmatmul.msk.bf16.vlgmr.msrb.gmra.mxu1 %vm872_vm8, %v1029_v51  ;;  %v1741_v51 = vld [vmem:[%s755_s6] ss:$0 sm:$0xff]  ;;  %s2217_s6 = sld [smem:[#allocation4_spill]] }
 0x569   : > { %1222 = vmatpush.bf16.msra.mxu1 %v1670_v26 }
 0x56d   : > { %1223 = vmatpush.bf16.msra.mxu1 %v1669_v27 }
 0x56e   : > { %p1649_p8 = scmp.ne.s32.totalorder %s2217_s6, 1 }
 0x56f   : > { %s2218_s20 = sld [smem:[#allocation20_spill]] (!%p1649_p8) }
 0x571   : > { %v967_v54 = vpop.permute.xlu1 %966 }
 0x572   : > { %v972_v55 = vsel %vm910_vm7, %v967_v54, 0 }
 0x573   : > { %981 = vmatpush.bf16.msra.mxu2 %v972_v55 }
 0x576   : > { %1594 = vmatmul.msk.bf16.vlgmr.msra.gmra.mxu2 %vm872_vm8, %v965_v57 }
 0x577   : > { %1109 = vmatpush.bf16.msrb.mxu2 %v1100_v56 }
 0x59c   : > { %v1090_v58 = vpop.xlane.xlu1 %1089 }
 0x59d   : > { %1761 = vrcp.f32 %v1090_v58 }
 0x5a3   : > { %v1762_v59 = vpop.eup %1761 }
 0x5a4   : > { %v1092_v60 = vmul.f32 %v1762_v59, %v1756_v42 }
 0x5a6   : > { %v1093_v61 = vpack.c.bf16 %v1092_v60, %v1092_v60 }
 0x5a8   : > { %1598 = vmatmul.msk.bf16.vlgmr.msrb.gmra.mxu2 %vm872_vm8, %v1093_v61 }
 0x5e5   : > { %v1047_v62 = vpop.f32.mrf.mxu1 }
 0x5e6   : > { %v1051_v63 = vpack.c.bf16 %v1047_v62, %v1047_v62 }
 0x5e8   : > { %1053 = vrot.lane.b32.xlu0 %v1051_v63, %s1820_s0 }
 0x5ed   : > { %v1049_v0 = vpop.f32.mrf.mxu1 }
 0x5ee   : > { %v1742_v0 = vld [vmem:[%s763_s25] ss:$0 sm:$0xff] }
 0x5f9   : > { %v983_v1 = vpop.f32.mrf.mxu2 }
 0x5fa   : > { %v987_v2 = vpack.c.bf16 %v983_v1, %v983_v1 }
 0x5fc   : > { %989 = vrot.lane.b32.xlu2 %v987_v2, %s1821_s23 }
 0x601   : > { %v985_v3 = vpop.f32.mrf.mxu2 }
 0x62b   : > { %v1111_v4 = vpop.f32.mrf.mxu2 }
 0x62c   : > { %v1115_v5 = vpack.c.bf16 %v1111_v4, %v1111_v4 }
 0x62e   : > { %1117 = vrot.lane.b32.xlu2 %v1115_v5, %s1822_s7  ;;  %s2219_s7 = sld [smem:[#allocation21_spill]] (!%p1649_p8) }
 0x633   : > { %v1113_v6 = vpop.f32.mrf.mxu2 }
 0x656   : > { %v990_v8 = vpop.permute.xlu2 %989 }
 0x657   : > { %993 = vst.msk [vmem:[#allocation3] sm:$0xf] %vm992_vm10, %v990_v8 }
 0x65a   : > { %v1054_v9 = vpop.permute.xlu0 %1053 }
 0x65b   : > { %1057 = vst.msk [vmem:[#allocation3] sm:$0xf] %vm1056_vm11, %v1054_v9 }
 0x688   : > { %v1118_v11 = vpop.permute.xlu2 %1117 }
 0x689   : > { %1121 = vst.msk [vmem:[#allocation3] sm:$0xf] %vm1120_vm12, %v1118_v11 }
 0x690   : > { %v1122_v12 = vld [vmem:[#allocation3] sm:$0xf] }
 0x691   : > { %1607 = vmatmul.msk.bf16.vlgmr.msra.gmra.mxu0 %vm797_vm2, %v1122_v12 }
 0x70e   : > { %v1155_v14 = vpop.f32.mrf.mxu0 }
 0x70f   : > { %v1156_v16 = vadd.f32 %v1738_v13, %v1155_v14 }
 0x711   : > { %v2087_v17 = vadd.f32 %v1156_v16, %v2017_v15  ;;  %v1678_v15 = vld [vmem:[%s2002_s8 + $0x38] sm:$0xff] }
 0x712   : > { %1307 = vmatpush.bf16.msrb.mxu3 %v1678_v15 }
 0x713   : > { %v1162_v18 = vsel %vm797_vm2, %v2087_v17, 0.0 }
 0x714   : > { %1163 = vadd.xlane.f32.xlu0 %v1162_v18 }
 0x716   : > { %v1157_v19 = vpop.f32.mrf.mxu0  ;;  %1308 = vmatpush.bf16.msrb.mxu3 %v1677_v43 }
 0x71a   : > { %1309 = vmatpush.bf16.msrb.mxu3 %v1676_v44 }
 0x71e   : > { %1310 = vmatpush.bf16.msrb.mxu3 %v1675_v45 }
 0x722   : > { %1311 = vmatpush.bf16.msrb.mxu3 %v1674_v46 }
 0x726   : > { %1312 = vmatpush.bf16.msrb.mxu3 %v1673_v47 }
 0x72a   : > { %1313 = vmatpush.bf16.msrb.mxu3 %v1672_v49 }
 0x72e   : > { %1314 = vmatpush.bf16.msrb.mxu3 %v1671_v50 }
 0x787   : > { %v1164_v20 = vpop.xlane.xlu0 %1163 }
 0x788   : > { %v1165_v21 = vmul.f32 %v1164_v20, %v2021_v23 }
 0x78a   : > { %v1166_v22 = vsub.f32 %v2087_v17, %v1165_v21 }
 0x78c   : > { %v1167_v24 = vmul.f32 %v1166_v22, %v1166_v22 }
 0x78e   : > { %v1168_v25 = vsel %vm797_vm2, %v1167_v24, 0.0 }
 0x78f   : > { %1169 = vadd.xlane.f32.xlu1 %v1168_v25 }
 0x802   : > { %v1170_v28 = vpop.xlane.xlu1 %1169 }
 0x803   : > { %v1171_v29 = vmul.f32 %v1170_v28, %v2021_v23  ;;  %v1739_v23 = vld [vmem:[%s2213_s18] ss:$0 sm:$0xff] }
 0x805   : > { %v1172_v30 = vadd.f32 1e-05, %v1171_v29 }
 0x807   : > { %1763 = vrsqrt.f32 %v1172_v30  ;;  %vm1179_vm14 = vweird.f32 %v1172_v30 }
 0x80d   : > { %v1764_v31 = vpop.eup %1763 }
 0x80e   : > { %v1174_v32 = vmul.f32 %v1764_v31, %v1172_v30  ;;  %vm1180_vm13 = vweird.f32 %v1764_v31 }
 0x80f   : > { %vm1181_vm15 = vmor %vm1179_vm14, %vm1180_vm13 }
 0x810   : > { %v1175_v33 = vmul.f32 %v1764_v31, %v1174_v32 }
 0x812   : > { %v1176_v34 = vmul.f32 0.5, %v1175_v33 }
 0x814   : > { %v1177_v35 = vsub.f32 1.5, %v1176_v34 }
 0x816   : > { %v1178_v36 = vmul.f32 %v1764_v31, %v1177_v35 }
 0x818   : > { %v1182_v37 = vsel %vm1181_vm15, %v1764_v31, %v1178_v36 }
 0x819   : > { %v1183_v38 = vmul.f32 %v1182_v37, %v1166_v22 }
 0x81b   : > { %v1187_v40 = vmul.f32 %v1739_v23, %v1183_v38 }
 0x81d   : > { %v1191_v41 = vadd.f32 %v1740_v39, %v1187_v40 }
 0x81f   : > { %v1192_v42 = vpack.c.bf16 %v1191_v41, %v1191_v41 }
 0x821   : > { %1616 = vmatmul.msk.bf16.vlgmr.msra.gmra.mxu1 %vm797_vm2, %v1192_v42 }
 0x89e   : > { %v1225_v48 = vpop.f32.mrf.mxu1 }
 0x89f   : > { %v1226_v52 = vadd.f32 %v1741_v51, %v1225_v48 }
 0x8a1   : > { %v1229_v53 = vmul.f32 %v1226_v52, %v1226_v52 }
 0x8a3   : > { %v1230_v54 = vmul.f32 %v1229_v53, %v1226_v52 }
 0x8a5   : > { %v1231_v55 = vmul.f32 0.044715, %v1230_v54 }
 0x8a6   : > { %v1227_v56 = vpop.f32.mrf.mxu1 }
 0x8a7   : > { %v1232_v57 = vadd.f32 %v1231_v55, %v1226_v52 }
 0x8a9   : > { %v1233_v58 = vmul.f32 0.7978846, %v1232_v57 }
 0x8ab   : > { %1765 = vtanh.f32 %v1233_v58 }
 0x8b1   : > { %v1766_v59 = vpop.eup %1765 }
 0x8b2   : > { %v1235_v60 = vadd.f32 1.0, %v1766_v59 }
 0x8b4   : > { %v1236_v61 = vmul.f32 0.5, %v1235_v60 }
 0x8b6   : > { %v1237_v62 = vmul.f32 %v1236_v61, %v1226_v52 }
 0x8b8   : > { %v1238_v63 = vpack.c.bf16 %v1237_v62, %v1237_v62 }
 0x8ba   : > { %1315 = vmatmul.bf16.vlgmr.msrb.gmra.mxu3 %v1238_v63 }
 0x93d   : > { %v1316_v1 = vpop.f32.mrf.mxu3 }
 0x93e   : > { %v1317_v2 = vadd.f32 %v1742_v0, %v1316_v1 }
 0x940   : > { %v1320_v3 = vadd.f32 %v1317_v2, %v2087_v17 }
 0x941   : > { %1325 = sbr.rel (%p1649_p8) target bundleno = 2516 (0x9d4), region = 96 }
 0x942   : > { %1321 = vst.msk [vmem:[#allocation2] sm:$0xff] %vm797_vm2, %v1320_v3 }
 0x945   : > { %v1318_v4 = vpop.f32.mrf.mxu3 }
 0x946   : > { %v1680_v5 = vld [vmem:[%s2218_s20 + $0x8] sm:$0xff]  ;;  %v1679_v6 = vld [vmem:[%s2218_s20] sm:$0xff]  ;;  %v1326_v7 = vpack.c.bf16 %v1320_v3, %v1320_v3  ;;  %vm1363_vm0 = vcmask 130048  }
 0x947   : > { %1356 = vmatpush.bf16.msra.mxu0 %v1680_v5  ;;  %v1767_v8 = vld [vmem:[%s2219_s7] ss:$0 sm:$0xff] }
 0x94b   : > { %1357 = vmatpush.bf16.msra.mxu0 %v1679_v6 }
 0x94e   : > { %1658 = vmatmul.msk.bf16.vlgmr.msra.gmra.mxu0 %vm797_vm2, %v1326_v7 }
 0x9cb   : > { %v1359_v9 = vpop.f32.mrf.mxu0 }
 0x9cc   : > { %v1360_v10 = vadd.f32 %v1767_v8, %v1359_v9 }
 0x9ce   : > { %1364 = vst.msk [vmem:[%s2011_s1] sm:$0xff] %vm1363_vm0, %v1360_v10 }
 0x9d3   : > { %v1361_v11 = vpop.f32.mrf.mxu0 }
 0x9d4 PF: > { %s2220_s10 = sld [smem:[#allocation7_spill]] }
 0x9d5   : > { %s2221_s24 = sld [smem:[#allocation5_spill]] }
 0x9d6   : > { %s2222_s25 = sld [smem:[#allocation6_spill]] }
 0x9d7   : > { %s2223_s26 = sld [smem:[#allocation8_spill]] }
 0x9d8   : > { %s2224_s27 = sld [smem:[#allocation9_spill]] }
 0x9da   : > { %s27_s28 = sadd.s32 1, %s2220_s10  }
 0x9db   : > { %p24_p9 = scmp.ge.s32.totalorder %s27_s28, 6  }
 0x9dd   :  { %26 = sbr.rel (!%p24_p9) target bundleno = 14 (0xe), region = 165 }

// kernel: _lambda_.3
= control target key start
LH: loop header
LB: loop body
LE: loop exit
PB: predicated region body
PF: predicated region fallthrough
CT: control target
= control target key end

     0   :  { %vm1282_vm0 = vcmask 1045504   ;;  %vm1283_vm1 = vcmask 1046528   ;;  %vm1278_vm2 = vcmask 1022976   ;;  %vm1561_vm3 = vcmask 523264   ;;  %s3079_s1 = inlined_call_operand.vmem [shape: bf16[2301,64], index: 1, kind: input, shape index: {}]   ;;  %s3080_s0 = inlined_call_operand.vmem [shape: f32[4,2301], index: 0, kind: input, shape index: {}]   ;;  %s3081_s2 = inlined_call_operand.vmem [shape: f32[1,64], index: 2, kind: input, shape index: {}]   ;;  %s3082_s4 = inlined_call_operand.vmem [shape: f32[1,32], index: 4, kind: input, shape index: {}]   ;;  %s3083_s3 = inlined_call_operand.vmem [shape: bf16[64,32], index: 3, kind: input, shape index: {}]   ;;  %s3084_s5 = inlined_call_operand.vmem [shape: bf16[32,32], index: 5, kind: input, shape index: {}]   ;;  %s3085_s6 = inlined_call_operand.vmem [shape: f32[1,32], index: 6, kind: input, shape index: {}]   ;;  %s3086_s7 = inlined_call_operand.vmem [shape: bf16[32,32], index: 7, kind: input, shape index: {}]   ;;  %s3087_s8 = inlined_call_operand.vmem [shape: f32[1,32], index: 8, kind: input, shape index: {}]   ;;  %s3088_s9 = inlined_call_operand.vmem [shape: bf16[32,32], index: 9, kind: input, shape index: {}]   ;;  %s3089_s10 = inlined_call_operand.vmem [shape: f32[1,32], index: 10, kind: input, shape index: {}]   ;;  %s3090_s11 = inlined_call_operand.vmem [shape: f32[4,32], index: 11, kind: output, shape index: {}]  }
   0x1   :  { %v2328_v0 = vld [vmem:[%s3079_s1 + $0x38] sm:$0xff]  ;;  %v2327_v4 = vld [vmem:[%s3079_s1 + $0x30] sm:$0xff]  ;;  %v2326_v8 = vld [vmem:[%s3079_s1 + $0x28] sm:$0xff]  ;;  %vm1600_vm4 = vcmask 261120   ;;  %vm1694_vm5 = vcmask 257024  }
   0x2   :  { %v2336_v1 = vld [vmem:[%s3079_s1 + $0x78] sm:$0xff]  ;;  %1289 = vmatpush.bf16.msra.mxu0 %v2328_v0  ;;  %v2335_v5 = vld [vmem:[%s3079_s1 + $0x70] sm:$0xff]  ;;  %v2334_v9 = vld [vmem:[%s3079_s1 + $0x68] sm:$0xff] }
   0x3   :  { %v2344_v2 = vld [vmem:[%s3079_s1 + $0xb8] sm:$0xff]  ;;  %1302 = vmatpush.bf16.msra.mxu1 %v2336_v1  ;;  %v2343_v6 = vld [vmem:[%s3079_s1 + $0xb0] sm:$0xff]  ;;  %v2342_v10 = vld [vmem:[%s3079_s1 + $0xa8] sm:$0xff] }
   0x4   :  { %v2352_v3 = vld [vmem:[%s3079_s1 + $0xf8] sm:$0xff]  ;;  %1315 = vmatpush.bf16.msra.mxu2 %v2344_v2  ;;  %v2351_v7 = vld [vmem:[%s3079_s1 + $0xf0] sm:$0xff]  ;;  %v2350_v11 = vld [vmem:[%s3079_s1 + $0xe8] sm:$0xff] }
   0x5   :  { %1328 = vmatpush.bf16.msra.mxu3 %v2352_v3  ;;  %v2325_v12 = vld [vmem:[%s3079_s1 + $0x20] sm:$0xff]  ;;  %v2324_v16 = vld [vmem:[%s3079_s1 + $0x18] sm:$0xff]  ;;  %v40_v20 = vld [vmem:[%s3080_s0 + $0x8] sm:$0xff] }
   0x6   :  { %1290 = vmatpush.bf16.msra.mxu0 %v2327_v4  ;;  %v2333_v13 = vld [vmem:[%s3079_s1 + $0x60] sm:$0xff]  ;;  %v2332_v17 = vld [vmem:[%s3079_s1 + $0x58] sm:$0xff]  ;;  %v2323_v22 = vld [vmem:[%s3079_s1 + $0x10] sm:$0xff]  ;;  %59 = vst [vmem:[#allocation1 + $0x10] ss:$2 sm:$0xff] %v40_v20 }
   0x7   :  { %1303 = vmatpush.bf16.msra.mxu1 %v2335_v5  ;;  %v2341_v14 = vld [vmem:[%s3079_s1 + $0xa0] sm:$0xff]  ;;  %v2340_v18 = vld [vmem:[%s3079_s1 + $0x98] sm:$0xff]  ;;  %v2331_v23 = vld [vmem:[%s3079_s1 + $0x50] sm:$0xff] }
   0x8   :  { %1316 = vmatpush.bf16.msra.mxu2 %v2343_v6  ;;  %v2349_v15 = vld [vmem:[%s3079_s1 + $0xe0] sm:$0xff]  ;;  %v2348_v19 = vld [vmem:[%s3079_s1 + $0xd8] sm:$0xff]  ;;  %v2339_v24 = vld [vmem:[%s3079_s1 + $0x90] sm:$0xff] }
   0x9   :  { %1329 = vmatpush.bf16.msra.mxu3 %v2351_v7  ;;  %v39_v21 = vld [vmem:[%s3080_s0] sm:$0xff]  ;;  %v2347_v25 = vld [vmem:[%s3079_s1 + $0xd0] sm:$0xff]  ;;  %v2322_v26 = vld [vmem:[%s3079_s1 + $0x8] sm:$0xff] }
   0xa   :  { %1291 = vmatpush.bf16.msra.mxu0 %v2326_v8  ;;  %57 = vst [vmem:[#allocation1] ss:$2 sm:$0xff] %v39_v21  ;;  %v2330_v27 = vld [vmem:[%s3079_s1 + $0x48] sm:$0xff]  ;;  %v2321_v31 = vld [vmem:[%s3079_s1] sm:$0xff]  ;;  %v2360_v38 = vld [vmem:[%s3079_s1 + $0x138] sm:$0xff] }
   0xb   :  { %1304 = vmatpush.bf16.msra.mxu1 %v2334_v9  ;;  %v2338_v28 = vld [vmem:[%s3079_s1 + $0x88] sm:$0xff]  ;;  %v43_v32 = vld [vmem:[%s3080_s0 + $0x20] sm:$0xff]  ;;  %v2368_v40 = vld [vmem:[%s3079_s1 + $0x178] sm:$0xff] }
   0xc   :  { %1317 = vmatpush.bf16.msra.mxu2 %v2342_v10  ;;  %v2346_v29 = vld [vmem:[%s3079_s1 + $0xc8] sm:$0xff]  ;;  %v2329_v35 = vld [vmem:[%s3079_s1 + $0x40] sm:$0xff]  ;;  %v2376_v41 = vld [vmem:[%s3079_s1 + $0x1b8] sm:$0xff] }
   0xd   :  { %1330 = vmatpush.bf16.msra.mxu3 %v2350_v11  ;;  %v44_v30 = vld [vmem:[%s3080_s0 + $0x28] sm:$0xff]  ;;  %v66_v33 = vld.sshfl [vmem:[#allocation1 + $0x10] sm:$0xff pattern:$0x75316420]  ;;  %v2337_v37 = vld [vmem:[%s3079_s1 + $0x80] sm:$0xff] }
   0xe   :  { %1292 = vmatpush.bf16.msra.mxu0 %v2325_v12  ;;  %v67_v34 = vld.sshfl [vmem:[#allocation1 + $0x18] sm:$0xff pattern:$0x75316420]  ;;  %v2345_v42 = vld [vmem:[%s3079_s1 + $0xc0] sm:$0xff]  ;;  %v41_v45 = vld [vmem:[%s3080_s0 + $0x10] sm:$0xff]  ;;  %v107_v47 = vpack.c.bf16 %v66_v33, %v66_v33 }
   0xf   :  { %1305 = vmatpush.bf16.msra.mxu1 %v2333_v13  ;;  %73 = vst [vmem:[#allocation1 + $0x10] ss:$2 sm:$0xff] %v44_v30  ;;  %v42_v44 = vld [vmem:[%s3080_s0 + $0x18] sm:$0xff]  ;;  %v2359_v48 = vld [vmem:[%s3079_s1 + $0x130] sm:$0xff]  ;;  %v108_v52 = vpack.c.bf16 %v67_v34, %v67_v34  ;;  %v2358_v54 = vld [vmem:[%s3079_s1 + $0x128] sm:$0xff] }
  0x10   :  { %1318 = vmatpush.bf16.msra.mxu2 %v2341_v14  ;;  %v2384_v46 = vld [vmem:[%s3079_s1 + $0x1f8] sm:$0xff]  ;;  %63 = vst [vmem:[#allocation1 + $0x30] ss:$2 sm:$0xff] %v42_v44  ;;  %v2367_v50 = vld [vmem:[%s3079_s1 + $0x170] sm:$0xff]  ;;  %v2366_v56 = vld [vmem:[%s3079_s1 + $0x168] sm:$0xff] }
  0x11   :  { %1331 = vmatpush.bf16.msra.mxu3 %v2349_v15  ;;  %v64_v36 = vld.sshfl [vmem:[#allocation1] sm:$0xff pattern:$0x75316420]  ;;  %v65_v39 = vld.sshfl [vmem:[#allocation1 + $0x8] sm:$0xff pattern:$0x75316420] }
  0x12   :  { %1293 = vmatpush.bf16.msra.mxu0 %v2324_v16  ;;  %72 = vst [vmem:[#allocation1] ss:$2 sm:$0xff] %v43_v32  ;;  %v105_v43 = vpack.c.bf16 %v64_v36, %v64_v36  ;;  %v106_v49 = vpack.c.bf16 %v65_v39, %v65_v39  ;;  %v2375_v51 = vld [vmem:[%s3079_s1 + $0x1b0] sm:$0xff]  ;;  %v46_v55 = vld [vmem:[%s3080_s0 + $0x38] sm:$0xff]  ;;  %v2374_v57 = vld [vmem:[%s3079_s1 + $0x1a8] sm:$0xff] }
  0x13   :  { %1306 = vmatpush.bf16.msra.mxu1 %v2332_v17  ;;  %61 = vst [vmem:[#allocation1 + $0x20] ss:$2 sm:$0xff] %v41_v45  ;;  %v2383_v53 = vld [vmem:[%s3079_s1 + $0x1f0] sm:$0xff]  ;;  %v2382_v60 = vld [vmem:[%s3079_s1 + $0x1e8] sm:$0xff]  ;;  %v2357_v61 = vld [vmem:[%s3079_s1 + $0x120] sm:$0xff] }
  0x14   :  { %1319 = vmatpush.bf16.msra.mxu2 %v2340_v18  ;;  %v45_v62 = vld [vmem:[%s3080_s0 + $0x30] sm:$0xff]  ;;  %v2365_v1 = vld [vmem:[%s3079_s1 + $0x160] sm:$0xff]  ;;  %v2356_v4 = vld [vmem:[%s3079_s1 + $0x118] sm:$0xff] }
  0x15   :  { %1332 = vmatpush.bf16.msra.mxu3 %v2348_v19  ;;  %v2373_v2 = vld [vmem:[%s3079_s1 + $0x1a0] sm:$0xff]  ;;  %v2364_v5 = vld [vmem:[%s3079_s1 + $0x158] sm:$0xff]  ;;  %v2355_v8 = vld [vmem:[%s3079_s1 + $0x110] sm:$0xff] }
  0x16   :  { %1294 = vmatpush.bf16.msra.mxu0 %v2323_v22  ;;  %v2381_v3 = vld [vmem:[%s3079_s1 + $0x1e0] sm:$0xff]  ;;  %v2372_v6 = vld [vmem:[%s3079_s1 + $0x198] sm:$0xff]  ;;  %v2363_v9 = vld [vmem:[%s3079_s1 + $0x150] sm:$0xff] }
  0x17   :  { %1307 = vmatpush.bf16.msra.mxu1 %v2331_v23  ;;  %v2692_v58 = vld.sshfl [vmem:[#allocation1 + $0x30] sm:$0xff pattern:$0x75316420]  ;;  %v2694_v59 = vld.sshfl [vmem:[#allocation1 + $0x38] sm:$0xff pattern:$0x75316420] }
  0x18   :  { %1320 = vmatpush.bf16.msra.mxu2 %v2339_v24  ;;  %75 = vst [vmem:[#allocation1 + $0x30] ss:$2 sm:$0xff] %v46_v55  ;;  %v2380_v7 = vld [vmem:[%s3079_s1 + $0x1d8] sm:$0xff]  ;;  %v2371_v10 = vld [vmem:[%s3079_s1 + $0x190] sm:$0xff]  ;;  %v2354_v12 = vld [vmem:[%s3079_s1 + $0x108] sm:$0xff]  ;;  %v111_v24 = vpack.c.bf16 %v2692_v58, %v2692_v58  ;;  %v112_v33 = vpack.c.bf16 %v2694_v59, %v2694_v59 }
  0x19   :  { %1333 = vmatpush.bf16.msra.mxu3 %v2347_v25  ;;  %v2379_v11 = vld [vmem:[%s3079_s1 + $0x1d0] sm:$0xff]  ;;  %v2362_v13 = vld [vmem:[%s3079_s1 + $0x148] sm:$0xff]  ;;  %v2353_v16 = vld [vmem:[%s3079_s1 + $0x100] sm:$0xff] }
  0x1a   :  { %1295 = vmatpush.bf16.msra.mxu0 %v2322_v26  ;;  %v2705_v63 = vld.sshfl [vmem:[#allocation1 + $0x20] sm:$0xff pattern:$0x75316420]  ;;  %v2707_v0 = vld.sshfl [vmem:[#allocation1 + $0x28] sm:$0xff pattern:$0x75316420] }
  0x1b   :  { %1308 = vmatpush.bf16.msra.mxu1 %v2330_v27  ;;  %74 = vst [vmem:[#allocation1 + $0x20] ss:$2 sm:$0xff] %v45_v62  ;;  %v2370_v14 = vld [vmem:[%s3079_s1 + $0x188] sm:$0xff]  ;;  %v2361_v17 = vld [vmem:[%s3079_s1 + $0x140] sm:$0xff]  ;;  %v2392_v19 = vld [vmem:[%s3079_s1 + $0x238] sm:$0xff]  ;;  %v109_v26 = vpack.c.bf16 %v2705_v63, %v2705_v63  ;;  %v110_v27 = vpack.c.bf16 %v2707_v0, %v2707_v0 }
  0x1c   :  { %1321 = vmatpush.bf16.msra.mxu2 %v2338_v28  ;;  %v2378_v15 = vld [vmem:[%s3079_s1 + $0x1c8] sm:$0xff]  ;;  %v2369_v18 = vld [vmem:[%s3079_s1 + $0x180] sm:$0xff]  ;;  %v2400_v20 = vld [vmem:[%s3079_s1 + $0x278] sm:$0xff] }
  0x1d   :  { %1334 = vmatpush.bf16.msra.mxu3 %v2346_v29  ;;  %v2408_v21 = vld [vmem:[%s3079_s1 + $0x2b8] sm:$0xff]  ;;  %v2377_v22 = vld [vmem:[%s3079_s1 + $0x1c0] sm:$0xff]  ;;  %v2391_v25 = vld [vmem:[%s3079_s1 + $0x230] sm:$0xff] }
  0x1e   :  { %1296 = vmatpush.bf16.msra.mxu0 %v2321_v31  ;;  %v2416_v23 = vld [vmem:[%s3079_s1 + $0x2f8] sm:$0xff]  ;;  %v2787_v28 = vld.sshfl [vmem:[#allocation1] sm:$0xff pattern:$0x75316420]  ;;  %v2399_v29 = vld [vmem:[%s3079_s1 + $0x270] sm:$0xff] }
  0x1f   :  { %1309 = vmatpush.bf16.msra.mxu1 %v2329_v35  ;;  %v47_v30 = vld [vmem:[%s3080_s0 + $0x40] sm:$0xff]  ;;  %v2795_v31 = vld.sshfl [vmem:[#allocation1 + $0x8] sm:$0xff pattern:$0x75316420]  ;;  %v2407_v32 = vld [vmem:[%s3079_s1 + $0x2b0] sm:$0xff]  ;;  %v113_v63 = vpack.c.bf16 %v2787_v28, %v2787_v28  ;;  %v2481_v28 = vmov 65535  }
  0x20   :  { %1322 = vmatpush.bf16.msra.mxu2 %v2337_v37  ;;  %84 = vst [vmem:[#allocation1] ss:$2 sm:$0xff] %v47_v30  ;;  %v2415_v34 = vld [vmem:[%s3079_s1 + $0x2f0] sm:$0xff]  ;;  %v2390_v35 = vld [vmem:[%s3079_s1 + $0x228] sm:$0xff]  ;;  %v2389_v39 = vld [vmem:[%s3079_s1 + $0x220] sm:$0xff] }
  0x21   :  { %1335 = vmatpush.bf16.msra.mxu3 %v2345_v42  ;;  %1297 = vmatmul.bf16.vlgmr.msra.gmra.mxu0 %v105_v43  ;;  %v2398_v36 = vld [vmem:[%s3079_s1 + $0x268] sm:$0xff]  ;;  %v2413_v42 = vld [vmem:[%s3079_s1 + $0x2e0] sm:$0xff]  ;;  %v2388_v43 = vld [vmem:[%s3079_s1 + $0x218] sm:$0xff] }
  0x22   :  { %1341 = vmatpush.bf16.msrb.mxu0 %v2360_v38  ;;  %1310 = vmatmul.bf16.vlgmr.msra.gmra.mxu1 %v106_v49  ;;  %v2406_v37 = vld [vmem:[%s3079_s1 + $0x2a8] sm:$0xff]  ;;  %v2396_v44 = vld [vmem:[%s3079_s1 + $0x258] sm:$0xff]  ;;  %v2403_v49 = vld [vmem:[%s3079_s1 + $0x290] sm:$0xff] }
  0x23   :  { %1354 = vmatpush.bf16.msrb.mxu1 %v2368_v40  ;;  %1323 = vmatmul.bf16.vlgmr.msra.gmra.mxu2 %v107_v47  ;;  %v2414_v38 = vld [vmem:[%s3079_s1 + $0x2e8] sm:$0xff]  ;;  %v2397_v40 = vld [vmem:[%s3079_s1 + $0x260] sm:$0xff]  ;;  %v2404_v45 = vld [vmem:[%s3079_s1 + $0x298] sm:$0xff] }
  0x24   :  { %1367 = vmatpush.bf16.msrb.mxu2 %v2376_v41  ;;  %1336 = vmatmul.bf16.vlgmr.msra.gmra.mxu3 %v108_v52  ;;  %v2405_v41 = vld [vmem:[%s3079_s1 + $0x2a0] sm:$0xff]  ;;  %v2387_v47 = vld [vmem:[%s3079_s1 + $0x210] sm:$0xff]  ;;  %v2394_v52 = vld [vmem:[%s3079_s1 + $0x248] sm:$0xff] }
  0x25   :  { %1380 = vmatpush.bf16.msrb.mxu3 %v2384_v46  ;;  %v2412_v46 = vld [vmem:[%s3079_s1 + $0x2d8] sm:$0xff]  ;;  %v2385_v55 = vld [vmem:[%s3079_s1 + $0x200] sm:$0xff]  ;;  %v78_v59 = vld.sshfl [vmem:[#allocation1 + $0x10] sm:$0xff pattern:$0x75316420] }
  0x26   :  { %1342 = vmatpush.bf16.msrb.mxu0 %v2359_v48  ;;  %v2395_v48 = vld [vmem:[%s3079_s1 + $0x250] sm:$0xff]  ;;  %v2424_v58 = vld [vmem:[%s3079_s1 + $0x338] sm:$0xff]  ;;  %v2409_v62 = vld [vmem:[%s3079_s1 + $0x2c0] sm:$0xff] }
  0x27   :  { %1355 = vmatpush.bf16.msrb.mxu1 %v2367_v50  ;;  %v2411_v50 = vld [vmem:[%s3079_s1 + $0x2d0] sm:$0xff]  ;;  %v79_v0 = vld.sshfl [vmem:[#allocation1 + $0x18] sm:$0xff pattern:$0x75316420]  ;;  %v2426_v30 = vld [vmem:[%s3079_s1 + $0x348] sm:$0xff] }
  0x28   :  { %1368 = vmatpush.bf16.msrb.mxu2 %v2375_v51  ;;  %v2386_v51 = vld [vmem:[%s3079_s1 + $0x208] sm:$0xff] }
  0x29   :  { %1381 = vmatpush.bf16.msrb.mxu3 %v2383_v53  ;;  %v2402_v53 = vld [vmem:[%s3079_s1 + $0x288] sm:$0xff] }
  0x2a   :  { %1343 = vmatpush.bf16.msrb.mxu0 %v2358_v54  ;;  %v2410_v54 = vld [vmem:[%s3079_s1 + $0x2c8] sm:$0xff] }
  0x2b   :  { %1356 = vmatpush.bf16.msrb.mxu1 %v2366_v56  ;;  %v2393_v56 = vld [vmem:[%s3079_s1 + $0x240] sm:$0xff] }
  0x2c   :  { %1369 = vmatpush.bf16.msrb.mxu2 %v2374_v57  ;;  %v2401_v57 = vld [vmem:[%s3079_s1 + $0x280] sm:$0xff] }
  0x2d   :  { %1382 = vmatpush.bf16.msrb.mxu3 %v2382_v60  ;;  %v2432_v60 = vld [vmem:[%s3079_s1 + $0x378] sm:$0xff] }
  0x2e   :  { %1344 = vmatpush.bf16.msrb.mxu0 %v2357_v61  ;;  %v2440_v61 = vld [vmem:[%s3079_s1 + $0x3b8] sm:$0xff] }
  0x2f   :  { %1357 = vmatpush.bf16.msrb.mxu1 %v2365_v1  ;;  %v115_v1 = vpack.c.bf16 %v78_v59, %v78_v59  ;;  %v2450_v59 = vld [vmem:[%s3079_s1 + $0x408] sm:$0xff] }
  0x30   :  { %1370 = vmatpush.bf16.msrb.mxu2 %v2373_v2  ;;  %v2448_v2 = vld [vmem:[%s3079_s1 + $0x3f8] sm:$0xff] }
  0x31   :  { %1383 = vmatpush.bf16.msrb.mxu3 %v2381_v3  ;;  %v114_v3 = vpack.c.bf16 %v2795_v31, %v2795_v31  ;;  %v2434_v31 = vld [vmem:[%s3079_s1 + $0x388] sm:$0xff] }
  0x32   :  { %1345 = vmatpush.bf16.msrb.mxu0 %v2356_v4  ;;  %v2423_v4 = vld [vmem:[%s3079_s1 + $0x330] sm:$0xff] }
  0x33   :  { %1358 = vmatpush.bf16.msrb.mxu1 %v2364_v5  ;;  %v116_v5 = vpack.c.bf16 %v79_v0, %v79_v0  ;;  %v86_v0 = vld.sshfl [vmem:[#allocation1 + $0x8] sm:$0xff pattern:$0x75316420] }
  0x34   :  { %1371 = vmatpush.bf16.msrb.mxu2 %v2372_v6  ;;  %v2431_v6 = vld [vmem:[%s3079_s1 + $0x370] sm:$0xff] }
  0x35   :  { %1384 = vmatpush.bf16.msrb.mxu3 %v2380_v7  ;;  %v2439_v7 = vld [vmem:[%s3079_s1 + $0x3b0] sm:$0xff] }
  0x36   :  { %1346 = vmatpush.bf16.msrb.mxu0 %v2355_v8  ;;  %v2447_v8 = vld [vmem:[%s3079_s1 + $0x3f0] sm:$0xff] }
  0x37   :  { %1359 = vmatpush.bf16.msrb.mxu1 %v2363_v9  ;;  %v2422_v9 = vld [vmem:[%s3079_s1 + $0x328] sm:$0xff] }
  0x38   :  { %1372 = vmatpush.bf16.msrb.mxu2 %v2371_v10  ;;  %v2430_v10 = vld [vmem:[%s3079_s1 + $0x368] sm:$0xff] }
  0x39   :  { %1385 = vmatpush.bf16.msrb.mxu3 %v2379_v11  ;;  %v2438_v11 = vld [vmem:[%s3079_s1 + $0x3a8] sm:$0xff] }
  0x3a   :  { %1347 = vmatpush.bf16.msrb.mxu0 %v2354_v12  ;;  %v2446_v12 = vld [vmem:[%s3079_s1 + $0x3e8] sm:$0xff] }
  0x3b   :  { %1360 = vmatpush.bf16.msrb.mxu1 %v2362_v13  ;;  %v2421_v13 = vld [vmem:[%s3079_s1 + $0x320] sm:$0xff] }
  0x3c   :  { %1373 = vmatpush.bf16.msrb.mxu2 %v2370_v14  ;;  %v2429_v14 = vld [vmem:[%s3079_s1 + $0x360] sm:$0xff] }
  0x3d   :  { %1386 = vmatpush.bf16.msrb.mxu3 %v2378_v15  ;;  %v2437_v15 = vld [vmem:[%s3079_s1 + $0x3a0] sm:$0xff] }
  0x3e   :  { %1348 = vmatpush.bf16.msrb.mxu0 %v2353_v16  ;;  %v2445_v16 = vld [vmem:[%s3079_s1 + $0x3e0] sm:$0xff] }
  0x3f   :  { %1361 = vmatpush.bf16.msrb.mxu1 %v2361_v17  ;;  %v2420_v17 = vld [vmem:[%s3079_s1 + $0x318] sm:$0xff] }
  0x40   :  { %1374 = vmatpush.bf16.msrb.mxu2 %v2369_v18  ;;  %v2428_v18 = vld [vmem:[%s3079_s1 + $0x358] sm:$0xff] }
  0x41   :  { %1387 = vmatpush.bf16.msrb.mxu3 %v2377_v22  ;;  %1349 = vmatmul.bf16.vlgmr.msrb.gmra.mxu0 %v109_v26  ;;  %v2427_v22 = vld [vmem:[%s3079_s1 + $0x350] sm:$0xff]  ;;  %v2464_v26 = vld [vmem:[%s3079_s1 + $0x478] sm:$0x70] }
  0x42   :  { %1393 = vmatpush.bf16.msra.mxu0 %v2392_v19  ;;  %1362 = vmatmul.bf16.vlgmr.msrb.gmra.mxu1 %v110_v27  ;;  %v2436_v19 = vld [vmem:[%s3079_s1 + $0x398] sm:$0xff]  ;;  %v2418_v27 = vld [vmem:[%s3079_s1 + $0x308] sm:$0xff] }
  0x43   :  { %1406 = vmatpush.bf16.msra.mxu1 %v2400_v20  ;;  %1375 = vmatmul.bf16.vlgmr.msrb.gmra.mxu2 %v111_v24  ;;  %v2444_v20 = vld [vmem:[%s3079_s1 + $0x3d8] sm:$0xff]  ;;  %v2443_v24 = vld [vmem:[%s3079_s1 + $0x3d0] sm:$0xff] }
  0x44   :  { %1419 = vmatpush.bf16.msra.mxu2 %v2408_v21  ;;  %1388 = vmatmul.bf16.vlgmr.msrb.gmra.mxu3 %v112_v33  ;;  %v2419_v21 = vld [vmem:[%s3079_s1 + $0x310] sm:$0xff]  ;;  %v2442_v33 = vld [vmem:[%s3079_s1 + $0x3c8] sm:$0xff] }
  0x45   :  { %1432 = vmatpush.bf16.msra.mxu3 %v2416_v23  ;;  %v2435_v23 = vld [vmem:[%s3079_s1 + $0x390] sm:$0xff] }
  0x46   :  { %1394 = vmatpush.bf16.msra.mxu0 %v2391_v25  ;;  %v2274_v25 = vld [vmem:[%s3079_s1 + $0x478] sm:$0xf] }
  0x47   :  { %1407 = vmatpush.bf16.msra.mxu1 %v2399_v29  ;;  %v1284_v29 = vsel %vm1282_vm0, 4294967295, %v2481_v28  ;;  %v2468_v28 = vld [vmem:[%s3083_s3 + $0x18] sm:$0xff] }
  0x48   :  { %1420 = vmatpush.bf16.msra.mxu2 %v2407_v32  ;;  %v2275_v32 = vor.u32 %v2464_v26, %v2274_v25 }
  0x49   :  { %1433 = vmatpush.bf16.msra.mxu3 %v2415_v34  ;;  %v1285_v34 = vsel %vm1283_vm1, %v1284_v29, 0 }
  0x4a   :  { %1395 = vmatpush.bf16.msra.mxu0 %v2390_v35  ;;  %v2417_v35 = vld [vmem:[%s3079_s1 + $0x300] sm:$0xff] }
  0x4b   :  { %1408 = vmatpush.bf16.msra.mxu1 %v2398_v36  ;;  %v80_v36 = vld.sshfl [vmem:[#allocation1 + $0x20] sm:$0xff pattern:$0x75316420] }
  0x4c   :  { %1421 = vmatpush.bf16.msra.mxu2 %v2406_v37  ;;  %v2425_v37 = vld [vmem:[%s3079_s1 + $0x340] sm:$0xff] }
  0x4d   :  { %1434 = vmatpush.bf16.msra.mxu3 %v2414_v38  ;;  %v2456_v38 = vld [vmem:[%s3079_s1 + $0x438] sm:$0xff] }
  0x4e   :  { %1396 = vmatpush.bf16.msra.mxu0 %v2389_v39  ;;  %v81_v39 = vld.sshfl [vmem:[#allocation1 + $0x28] sm:$0xff pattern:$0x75316420] }
  0x4f   :  { %1409 = vmatpush.bf16.msra.mxu1 %v2397_v40  ;;  %v2433_v40 = vld [vmem:[%s3079_s1 + $0x380] sm:$0xff] }
  0x50   :  { %1422 = vmatpush.bf16.msra.mxu2 %v2405_v41  ;;  %v1287_v41 = vand.u32 %v2275_v32, %v1285_v34 }
  0x51   :  { %1435 = vmatpush.bf16.msra.mxu3 %v2413_v42  ;;  %v82_v42 = vld.sshfl [vmem:[#allocation1 + $0x30] sm:$0xff pattern:$0x75316420] }
  0x52   :  { %1397 = vmatpush.bf16.msra.mxu0 %v2388_v43  ;;  %v2441_v43 = vld [vmem:[%s3079_s1 + $0x3c0] sm:$0xff] }
  0x53   :  { %1410 = vmatpush.bf16.msra.mxu1 %v2396_v44  ;;  %v117_v44 = vpack.c.bf16 %v80_v36, %v80_v36  ;;  %v2466_v36 = vld [vmem:[%s3083_s3 + $0x8] sm:$0xff] }
  0x54   :  { %1423 = vmatpush.bf16.msra.mxu2 %v2404_v45  ;;  %v83_v45 = vld.sshfl [vmem:[#allocation1 + $0x38] sm:$0xff pattern:$0x75316420] }
  0x55   :  { %1436 = vmatpush.bf16.msra.mxu3 %v2412_v46  ;;  %v118_v46 = vpack.c.bf16 %v81_v39, %v81_v39 }
  0x56   :  { %1398 = vmatpush.bf16.msra.mxu0 %v2387_v47  ;;  %v119_v47 = vpack.c.bf16 %v82_v42, %v82_v42 }
  0x57   :  { %1411 = vmatpush.bf16.msra.mxu1 %v2395_v48  ;;  %v2455_v48 = vld [vmem:[%s3079_s1 + $0x430] sm:$0xff] }
  0x58   :  { %1424 = vmatpush.bf16.msra.mxu2 %v2403_v49  ;;  %v120_v49 = vpack.c.bf16 %v83_v45, %v83_v45 }
  0x59   :  { %1437 = vmatpush.bf16.msra.mxu3 %v2411_v50  ;;  %v2463_v50 = vld [vmem:[%s3079_s1 + $0x470] sm:$0xff] }
  0x5a   :  { %1399 = vmatpush.bf16.msra.mxu0 %v2386_v51  ;;  %v2454_v51 = vld [vmem:[%s3079_s1 + $0x428] sm:$0xff] }
  0x5b   :  { %1412 = vmatpush.bf16.msra.mxu1 %v2394_v52  ;;  %v2462_v52 = vld [vmem:[%s3079_s1 + $0x468] sm:$0xff] }
  0x5c   :  { %1425 = vmatpush.bf16.msra.mxu2 %v2402_v53  ;;  %v2453_v53 = vld [vmem:[%s3079_s1 + $0x420] sm:$0xff] }
  0x5d   :  { %1438 = vmatpush.bf16.msra.mxu3 %v2410_v54  ;;  %v2461_v54 = vld [vmem:[%s3079_s1 + $0x460] sm:$0xff] }
  0x5e   :  { %1400 = vmatpush.bf16.msra.mxu0 %v2385_v55  ;;  %v2452_v55 = vld [vmem:[%s3079_s1 + $0x418] sm:$0xff] }
  0x5f   :  { %1413 = vmatpush.bf16.msra.mxu1 %v2393_v56  ;;  %v2460_v56 = vld [vmem:[%s3079_s1 + $0x458] sm:$0xff] }
  0x60   :  { %1426 = vmatpush.bf16.msra.mxu2 %v2401_v57  ;;  %v2451_v57 = vld [vmem:[%s3079_s1 + $0x410] sm:$0xff] }
  0x61   :  { %1439 = vmatpush.bf16.msra.mxu3 %v2409_v62  ;;  %1401 = vmatmul.bf16.vlgmr.msra.gmra.mxu0 %v113_v63  ;;  %v85_v62 = vld.sshfl [vmem:[#allocation1] sm:$0xff pattern:$0x75316420] }
  0x62   :  { %1445 = vmatpush.bf16.msrb.mxu0 %v2424_v58  ;;  %1414 = vmatmul.bf16.vlgmr.msra.gmra.mxu1 %v114_v3  ;;  %v2459_v58 = vld [vmem:[%s3079_s1 + $0x450] sm:$0xff]  ;;  %v2457_v63 = vld [vmem:[%s3079_s1 + $0x440] sm:$0xff] }
  0x63   :  { %1458 = vmatpush.bf16.msrb.mxu1 %v2432_v60  ;;  %1427 = vmatmul.bf16.vlgmr.msra.gmra.mxu2 %v115_v1  ;;  %v2458_v60 = vld [vmem:[%s3079_s1 + $0x448] sm:$0xff]  ;;  %v121_v1 = vpack.c.bf16 %v85_v62, %v85_v62  ;;  %v2476_v3 = vld [vmem:[%s3081_s2] ss:$0 sm:$0xff] }
  0x64   :  { %1471 = vmatpush.bf16.msrb.mxu2 %v2440_v61  ;;  %1440 = vmatmul.bf16.vlgmr.msra.gmra.mxu3 %v116_v5  ;;  %v2449_v61 = vld [vmem:[%s3079_s1 + $0x400] sm:$0xff] }
  0x65   :  { %1484 = vmatpush.bf16.msrb.mxu3 %v2448_v2  ;;  %v122_v2 = vpack.c.bf16 %v86_v0, %v86_v0 }
  0x66   :  { %1446 = vmatpush.bf16.msrb.mxu0 %v2423_v4 }
  0x67   :  { %1459 = vmatpush.bf16.msrb.mxu1 %v2431_v6 }
  0x68   :  { %1472 = vmatpush.bf16.msrb.mxu2 %v2439_v7 }
  0x69   :  { %1485 = vmatpush.bf16.msrb.mxu3 %v2447_v8 }
  0x6a   :  { %1447 = vmatpush.bf16.msrb.mxu0 %v2422_v9 }
  0x6b   :  { %1460 = vmatpush.bf16.msrb.mxu1 %v2430_v10 }
  0x6c   :  { %1473 = vmatpush.bf16.msrb.mxu2 %v2438_v11 }
  0x6d   :  { %1486 = vmatpush.bf16.msrb.mxu3 %v2446_v12 }
  0x6e   :  { %1448 = vmatpush.bf16.msrb.mxu0 %v2421_v13 }
  0x6f   :  { %1461 = vmatpush.bf16.msrb.mxu1 %v2429_v14 }
  0x70   :  { %1474 = vmatpush.bf16.msrb.mxu2 %v2437_v15 }
  0x71   :  { %1487 = vmatpush.bf16.msrb.mxu3 %v2445_v16 }
  0x72   :  { %1449 = vmatpush.bf16.msrb.mxu0 %v2420_v17 }
  0x73   :  { %1462 = vmatpush.bf16.msrb.mxu1 %v2428_v18 }
  0x74   :  { %1475 = vmatpush.bf16.msrb.mxu2 %v2436_v19 }
  0x75   :  { %1488 = vmatpush.bf16.msrb.mxu3 %v2444_v20 }
  0x76   :  { %1450 = vmatpush.bf16.msrb.mxu0 %v2419_v21 }
  0x77   :  { %1463 = vmatpush.bf16.msrb.mxu1 %v2427_v22 }
  0x78   :  { %1476 = vmatpush.bf16.msrb.mxu2 %v2435_v23 }
  0x79   :  { %1489 = vmatpush.bf16.msrb.mxu3 %v2443_v24 }
  0x7a   :  { %1451 = vmatpush.bf16.msrb.mxu0 %v2418_v27 }
  0x7b   :  { %1464 = vmatpush.bf16.msrb.mxu1 %v2426_v30 }
  0x7c   :  { %1477 = vmatpush.bf16.msrb.mxu2 %v2434_v31  ;;  %v2467_v31 = vld [vmem:[%s3083_s3 + $0x10] sm:$0xff] }
  0x7d   :  { %1490 = vmatpush.bf16.msrb.mxu3 %v2442_v33 }
  0x7e   :  { %1452 = vmatpush.bf16.msrb.mxu0 %v2417_v35 }
  0x7f   :  { %1465 = vmatpush.bf16.msrb.mxu1 %v2425_v37 }
  0x80   :  { %1478 = vmatpush.bf16.msrb.mxu2 %v2433_v40  ;;  %v2465_v40 = vld [vmem:[%s3083_s3] sm:$0xff] }
  0x81   :  { %1491 = vmatpush.bf16.msrb.mxu3 %v2441_v43  ;;  %1453 = vmatmul.bf16.vlgmr.msrb.gmra.mxu0 %v117_v44  ;;  %v2470_v43 = vld [vmem:[%s3084_s5 + $0x8] sm:$0xff] }
  0x82   :  { %1497 = vmatpush.bf16.msra.mxu0 %v2456_v38  ;;  %1466 = vmatmul.bf16.vlgmr.msrb.gmra.mxu1 %v118_v46  ;;  %v2469_v46 = vld [vmem:[%s3084_s5] sm:$0xff] }
  0x83   :  { %1510 = vmatpush.bf16.msra.mxu1 %v1287_v41  ;;  %1479 = vmatmul.bf16.vlgmr.msrb.gmra.mxu2 %v119_v47 }
  0x84   :  { %1492 = vmatmul.bf16.vlgmr.msrb.gmra.mxu3 %v120_v49  ;;  %1569 = vmatpush.bf16.msra.mxu2 %v2468_v28 }
  0x85   :  { %1610 = vmatpush.bf16.msra.mxu3 %v2470_v43 }
  0x86   :  { %1498 = vmatpush.bf16.msra.mxu0 %v2455_v48 }
  0x87   :  { %1511 = vmatpush.bf16.msra.mxu1 %v2463_v50 }
  0x88   :  { %1570 = vmatpush.bf16.msra.mxu2 %v2467_v31 }
  0x89   :  { %1611 = vmatpush.bf16.msra.mxu3 %v2469_v46 }
  0x8a   :  { %1499 = vmatpush.bf16.msra.mxu0 %v2454_v51 }
  0x8b   :  { %1512 = vmatpush.bf16.msra.mxu1 %v2462_v52 }
  0x8c   :  { %1571 = vmatpush.bf16.msra.mxu2 %v2466_v36 }
  0x8e   :  { %1500 = vmatpush.bf16.msra.mxu0 %v2453_v53 }
  0x8f   :  { %1513 = vmatpush.bf16.msra.mxu1 %v2461_v54 }
  0x90   :  { %1572 = vmatpush.bf16.msra.mxu2 %v2465_v40 }
  0x92   :  { %1501 = vmatpush.bf16.msra.mxu0 %v2452_v55 }
  0x93   :  { %1514 = vmatpush.bf16.msra.mxu1 %v2460_v56 }
  0x96   :  { %1502 = vmatpush.bf16.msra.mxu0 %v2451_v57 }
  0x97   :  { %1515 = vmatpush.bf16.msra.mxu1 %v2459_v58 }
  0x9a   :  { %1503 = vmatpush.bf16.msra.mxu0 %v2450_v59 }
  0x9b   :  { %1516 = vmatpush.bf16.msra.mxu1 %v2458_v60 }
  0x9e   :  { %1504 = vmatpush.bf16.msra.mxu0 %v2449_v61  ;;  %v1298_v4 = vpop.f32.mrf.mxu0 }
  0x9f   :  { %1517 = vmatpush.bf16.msra.mxu1 %v2457_v63  ;;  %v1299_v5 = vadd.f32 %v2476_v3, %v1298_v4  ;;  %v1311_v6 = vpop.f32.mrf.mxu1  ;;  %v2471_v3 = vld [vmem:[%s3086_s7] sm:$0xff] }
  0xa0   :  { %v2477_v4 = vld [vmem:[%s3082_s4] ss:$0 sm:$0xff] }
  0xa1   :  { %1505 = vmatmul.bf16.vlgmr.msra.gmra.mxu0 %v121_v1  ;;  %v1312_v7 = vadd.f32 %v1311_v6, %v1299_v5 }
  0xa2   :  { %2276 = vmatmul.msk.bf16.vlgmr.msra.gmra.mxu1 %vm1278_vm2, %v122_v2  ;;  %v2472_v2 = vld [vmem:[%s3086_s7 + $0x8] sm:$0xff] }
  0xa3   :  { %1648 = vmatpush.bf16.msrb.mxu2 %v2472_v2 }
  0xa6   :  { %v1324_v8 = vpop.f32.mrf.mxu2  ;;  %v1300_v10 = vpop.f32.mrf.mxu0 }
  0xa7   :  { %v1325_v9 = vadd.f32 %v1324_v8, %v1312_v7  ;;  %v1337_v11 = vpop.f32.mrf.mxu3  ;;  %v1313_v12 = vpop.f32.mrf.mxu1  ;;  %1649 = vmatpush.bf16.msrb.mxu2 %v2471_v3  ;;  %v2474_v10 = vld [vmem:[%s3088_s9 + $0x8] sm:$0xff] }
  0xa8   :  { %1686 = vmatpush.bf16.msrb.mxu3 %v2474_v10  ;;  %v2478_v12 = vld [vmem:[%s3085_s6] ss:$0 sm:$0xff] }
  0xa9   :  { %v1338_v13 = vadd.f32 %v1337_v11, %v1325_v9  ;;  %v2473_v11 = vld [vmem:[%s3088_s9] sm:$0xff] }
  0xac   :  { %1687 = vmatpush.bf16.msrb.mxu3 %v2473_v11 }
  0xae   :  { %v1326_v14 = vpop.f32.mrf.mxu2 }
  0xaf   :  { %v1339_v15 = vpop.f32.mrf.mxu3 }
  0xbe   :  { %v1350_v16 = vpop.f32.mrf.mxu0 }
  0xbf   :  { %v1363_v17 = vpop.f32.mrf.mxu1  ;;  %v1351_v34 = vadd.f32 %v1350_v16, %v1338_v13 }
  0xc1   :  { %v1364_v35 = vadd.f32 %v1363_v17, %v1351_v34 }
  0xc6   :  { %v1376_v18 = vpop.f32.mrf.mxu2  ;;  %v1352_v20 = vpop.f32.mrf.mxu0 }
  0xc7   :  { %v1389_v19 = vpop.f32.mrf.mxu3  ;;  %v1365_v21 = vpop.f32.mrf.mxu1  ;;  %v1377_v37 = vadd.f32 %v1376_v18, %v1364_v35  ;;  %v2479_v18 = vld [vmem:[%s3087_s8] ss:$0 sm:$0xff] }
  0xc9   :  { %v1390_v41 = vadd.f32 %v1389_v19, %v1377_v37 }
  0xce   :  { %v1378_v22 = vpop.f32.mrf.mxu2 }
  0xcf   :  { %v1391_v23 = vpop.f32.mrf.mxu3 }
  0xde   :  { %v1402_v24 = vpop.f32.mrf.mxu0 }
  0xdf   :  { %v1415_v25 = vpop.f32.mrf.mxu1  ;;  %v1403_v42 = vadd.f32 %v1402_v24, %v1390_v41  ;;  %v2480_v24 = vld [vmem:[%s3089_s10] ss:$0 sm:$0xff] }
  0xe1   :  { %v1416_v49 = vadd.f32 %v1415_v25, %v1403_v42 }
  0xe6   :  { %v1428_v26 = vpop.f32.mrf.mxu2  ;;  %v1404_v27 = vpop.f32.mrf.mxu0 }
  0xe7   :  { %v1441_v29 = vpop.f32.mrf.mxu3  ;;  %v1417_v30 = vpop.f32.mrf.mxu1  ;;  %v1429_v50 = vadd.f32 %v1428_v26, %v1416_v49 }
  0xe9   :  { %v1442_v51 = vadd.f32 %v1441_v29, %v1429_v50 }
  0xee   :  { %v1430_v32 = vpop.f32.mrf.mxu2 }
  0xef   :  { %v1443_v33 = vpop.f32.mrf.mxu3 }
  0xfe   :  { %v1454_v38 = vpop.f32.mrf.mxu0 }
  0xff   :  { %v1467_v39 = vpop.f32.mrf.mxu1  ;;  %v1455_v54 = vadd.f32 %v1454_v38, %v1442_v51 }
 0x101   :  { %v1468_v55 = vadd.f32 %v1467_v39, %v1455_v54 }
 0x106   :  { %v1480_v44 = vpop.f32.mrf.mxu2  ;;  %v1456_v45 = vpop.f32.mrf.mxu0 }
 0x107   :  { %v1493_v47 = vpop.f32.mrf.mxu3  ;;  %v1469_v48 = vpop.f32.mrf.mxu1  ;;  %v1481_v56 = vadd.f32 %v1480_v44, %v1468_v55 }
 0x109   :  { %v1494_v57 = vadd.f32 %v1493_v47, %v1481_v56 }
 0x10e   :  { %v1482_v52 = vpop.f32.mrf.mxu2 }
 0x10f   :  { %v1495_v53 = vpop.f32.mrf.mxu3 }
 0x11e   :  { %v1506_v58 = vpop.f32.mrf.mxu0 }
 0x11f   :  { %v1507_v59 = vadd.f32 %v1506_v58, %v1494_v57  ;;  %v1519_v60 = vpop.f32.mrf.mxu1 }
 0x121   :  { %v1520_v61 = vadd.f32 %v1519_v60, %v1507_v59 }
 0x123   :  { %v1523_v62 = vmax.f32 %v1520_v61, 0.0 }
 0x125   :  { %v1524_v63 = vpack.c.bf16 %v1523_v62, %v1523_v62 }
 0x126   :  { %v1508_v0 = vpop.f32.mrf.mxu0 }
 0x127   :  { %v1521_v1 = vpop.f32.mrf.mxu1  ;;  %2293 = vmatmul.msk.bf16.vlgmr.msra.gmra.mxu2 %vm1561_vm3, %v1524_v63 }
 0x1aa   :  { %v1574_v5 = vpop.f32.mrf.mxu2 }
 0x1ab   :  { %v1575_v6 = vadd.f32 %v2477_v4, %v1574_v5 }
 0x1ad   :  { %v1578_v7 = vmax.f32 %v1575_v6, 0.0 }
 0x1af   :  { %v1579_v8 = vpack.c.bf16 %v1578_v7, %v1578_v7 }
 0x1b1   :  { %2302 = vmatmul.msk.bf16.vlgmr.msra.gmra.mxu3 %vm1600_vm4, %v1579_v8 }
 0x1b2   :  { %v1576_v9 = vpop.f32.mrf.mxu2 }
 0x234   :  { %v1613_v13 = vpop.f32.mrf.mxu3 }
 0x235   :  { %v1614_v14 = vadd.f32 %v2478_v12, %v1613_v13 }
 0x237   :  { %v1617_v15 = vmax.f32 %v1614_v14, 0.0 }
 0x239   :  { %v1618_v16 = vpack.c.bf16 %v1617_v15, %v1617_v15 }
 0x23b   :  { %2311 = vmatmul.msk.bf16.vlgmr.msrb.gmra.mxu2 %vm1600_vm4, %v1618_v16 }
 0x23c   :  { %v1615_v17 = vpop.f32.mrf.mxu3 }
 0x2be   :  { %v1651_v19 = vpop.f32.mrf.mxu2 }
 0x2bf   :  { %v1652_v20 = vadd.f32 %v2479_v18, %v1651_v19 }
 0x2c1   :  { %v1655_v21 = vmax.f32 %v1652_v20, 0.0 }
 0x2c3   :  { %v1656_v22 = vpack.c.bf16 %v1655_v21, %v1655_v21 }
 0x2c5   :  { %2320 = vmatmul.msk.bf16.vlgmr.msrb.gmra.mxu3 %vm1600_vm4, %v1656_v22 }
 0x2c6   :  { %v1653_v23 = vpop.f32.mrf.mxu2 }
 0x348   :  { %v1689_v25 = vpop.f32.mrf.mxu3 }
 0x349   :  { %v1690_v26 = vadd.f32 %v2480_v24, %v1689_v25 }
 0x34b   :  { %v1693_v27 = vmax.f32 %v1690_v26, 0.0 }
 0x34d   :  { %1695 = vst.msk [vmem:[%s3090_s11] sm:$0xf] %vm1694_vm5, %v1693_v27 }
 0x350   :  { %v1691_v28 = vpop.f32.mrf.mxu3 }

</bundles_post_ra>
